<compile_context>
chip_gen: v7x
topology: tpu7x:2x2x1
jax: 0.10.0
libtpu: 0.0.40
codegen_flags: <defaults>
</compile_context>

<pallas_src>
import math

import jax
import jax.numpy as jnp
from jax.experimental import pallas as pl
from jax.experimental.pallas import tpu as pltpu

LANE = 128
SUBLANE = 8


def _round_up(x, m):
    return (x + m - 1) // m * m


def _make_kernel(d_in, p):
    """Build the fused 3-layer MLP kernel. p = padded feature width (x128)."""

    def kernel(x_ref, w_ref, b_ref, o_ref):
        x = x_ref[...]                       # (TB, d_in)
        # Static, tile-aligned slices of the packed weight slab (3*p, p).
        w1 = w_ref[0:d_in, :]                # (d_in, p)
        w2 = w_ref[p:2 * p, :]               # (p, p)   zero-padded rows/cols
        w3 = w_ref[2 * p:3 * p, :]           # (p, p)   zero-padded rows/cols

        h1 = jnp.dot(x, w1, preferred_element_type=jnp.float32) + b_ref[0:1, :]
        h1 = jnp.maximum(h1, 0.0)
        h2 = jnp.dot(h1, w2, preferred_element_type=jnp.float32) + b_ref[1:2, :]
        h2 = jnp.maximum(h2, 0.0)
        out = jnp.dot(h2, w3, preferred_element_type=jnp.float32) + b_ref[2:3, :]
        o_ref[...] = out.astype(o_ref.dtype)

    return kernel


def pack_params(params):
    """Pack 6 nn.Linear tensors into 2 lane-dense slabs (2 param DMAs, not 6).

    Zero padding keeps the math exact: padded columns of h1/h2 are
    relu(0 + 0) = 0 and padded weight rows are 0, so they contribute nothing.
    """
    w1, b1 = params["w1"], params["b1"]
    w2, b2 = params["w2"], params["b2"]
    w3, b3 = params["w3"], params["b3"]
    d_in, h = w1.shape
    d_out = w3.shape[1]
    p = _round_up(max(d_in, h, d_out), LANE)

    w = jnp.zeros((3 * p, p), jnp.float32)
    w = w.at[0:d_in, 0:h].set(w1)
    w = w.at[p:p + h, 0:h].set(w2)
    w = w.at[2 * p:2 * p + h, 0:d_out].set(w3)

    b = jnp.zeros((3, p), jnp.float32)
    b = b.at[0, 0:h].set(b1.reshape(-1))
    b = b.at[1, 0:h].set(b2.reshape(-1))
    b = b.at[2, 0:d_out].set(b3.reshape(-1))

    return {"w": w, "b": b, "dims": (d_in, h, d_out), "p": p}


def value_network_forward(x, packed, *, tb=512):
    """x: (B, input_size) f32. packed: output of pack_params. -> (B, output_size)."""
    d_in, _h, d_out = packed["dims"]
    p = packed["p"]
    w, b = packed["w"], packed["b"]
    B = x.shape[0]
    assert x.shape[1] == d_in

    # Batch tiling: TB rows per grid step (>= B rounded to a sublane multiple
    # for small batches); pad B so the grid divides exactly.
    TB = min(tb, _round_up(B, SUBLANE))
    B_pad = _round_up(B, TB)
    if B_pad != B:
        x = jnp.pad(x, ((0, B_pad - B), (0, 0)))
    grid = (B_pad // TB,)

    flops = 2 * B_pad * (d_in * p + 2 * p * p)
    bytes_accessed = (x.size + w.size + b.size + B_pad * p) * 4

    out_pad = pl.pallas_call(
        _make_kernel(d_in, p),
        out_shape=jax.ShapeDtypeStruct((B_pad, p), jnp.float32),
        grid_spec=pltpu.PrefetchScalarGridSpec(
            num_scalar_prefetch=0,
            grid=grid,
            in_specs=[
                # batch tile of x (double-buffered by the pipeline)
                pl.BlockSpec((TB, d_in), lambda i: (i, 0)),
                # packed weights / biases: same block every step -> DMA'd once,
                # resident in VMEM for the whole call.
                pl.BlockSpec((3 * p, p), lambda i: (0, 0)),
                pl.BlockSpec((3, p), lambda i: (0, 0)),
            ],
            # lane-dense (TB, 128) output block -> unmasked stores
            out_specs=pl.BlockSpec((TB, p), lambda i: (i, 0)),
        ),
        compiler_params=pltpu.CompilerParams(
            dimension_semantics=("parallel",),   # shard batch grid across TCs (v7x)
        ),
        cost_estimate=pl.CostEstimate(
            flops=flops, transcendentals=0, bytes_accessed=bytes_accessed),
    )(x, w, b)

    # Slice off batch padding and the lane padding of the last layer.
    return out_pad[:B, :d_out]


def init_params(key, input_size, hidden_size, output_size):
    """nn.Linear-style init: U(-1/sqrt(fan_in), 1/sqrt(fan_in)); W stored (in, out)."""
    ks = jax.random.split(key, 6)

    def linear(kw, kb, fan_in, fan_out):
        bound = 1.0 / math.sqrt(fan_in)
        w = jax.random.uniform(kw, (fan_in, fan_out), jnp.float32, -bound, bound)
        b = jax.random.uniform(kb, (fan_out,), jnp.float32, -bound, bound)
        return w, b

    w1, b1 = linear(ks[0], ks[1], input_size, hidden_size)
    w2, b2 = linear(ks[2], ks[3], hidden_size, hidden_size)
    w3, b3 = linear(ks[4], ks[5], hidden_size, output_size)
    return {"w1": w1, "b1": b1, "w2": w2, "b2": b2, "w3": w3, "b3": b3}


if __name__ == "__main__":
    # CartPole-like sizes: 4-dim state, 32 hidden units, 2 actions.
    # B=500 is deliberately not a multiple of 8 or of the batch tile:
    # exercises row padding with resident weights.
    input_size, hidden_size, output_size = 4, 32, 2
    B = 500

    key = jax.random.PRNGKey(0)
    k_params, k_x = jax.random.split(key)
    params = init_params(k_params, input_size, hidden_size, output_size)
    packed = pack_params(params)
    x = jax.random.normal(k_x, (B, input_size), jnp.float32)

    out = jax.block_until_ready(value_network_forward(x, packed))

    # Pure-JAX reference check of the forward semantics.
    h = jnp.maximum(x @ params["w1"] + params["b1"], 0.0)
    h = jnp.maximum(h @ params["w2"] + params["b2"], 0.0)
    ref = h @ params["w3"] + params["b3"]
    assert out.shape == (B, output_size)
    assert jnp.allclose(out, ref, atol=1e-4, rtol=1e-5), "mismatch vs reference"

    print("KERNEL_OK")
</pallas_src>

<mosaic_0001>
module attributes {stable_mosaic.version = 11 : i64} {
  func.func @kernel(%arg0: i32, %arg1: memref<504x4xf32, #tpu.memory_space<vmem>>, %arg2: memref<384x128xf32, #tpu.memory_space<vmem>>, %arg3: memref<3x128xf32, #tpu.memory_space<vmem>>, %arg4: memref<504x128xf32, #tpu.memory_space<vmem>>) attributes {dimension_semantics = [#tpu.dimension_semantics<parallel>], iteration_bounds = array<i64: 1>, scalar_prefetch = 0 : i64, scratch_operands = 0 : i64, tpu.core_type = #tpu.core_type<tc>, window_params = [{transform_indices = @transform_0, window_bounds = array<i64: 504, 4>}, {pipeline_mode = #tpu.pipeline_mode<synchronous>, transform_indices = @transform_1, window_bounds = array<i64: 384, 128>}, {pipeline_mode = #tpu.pipeline_mode<synchronous>, transform_indices = @transform_2, window_bounds = array<i64: 3, 128>}, {transform_indices = @transform_3, window_bounds = array<i64: 504, 128>}]} {
    %c0 = arith.constant 0 : index
    %c0_0 = arith.constant 0 : index
    %0 = vector.load %arg1[%c0, %c0_0] : memref<504x4xf32, #tpu.memory_space<vmem>>, vector<504x4xf32>
    %c0_1 = arith.constant 0 : index
    %c0_2 = arith.constant 0 : index
    %1 = vector.load %arg2[%c0_1, %c0_2] : memref<384x128xf32, #tpu.memory_space<vmem>>, vector<4x128xf32>
    %c128 = arith.constant 128 : index
    %c0_3 = arith.constant 0 : index
    %2 = vector.load %arg2[%c128, %c0_3] : memref<384x128xf32, #tpu.memory_space<vmem>>, vector<128x128xf32>
    %c256 = arith.constant 256 : index
    %c0_4 = arith.constant 0 : index
    %3 = vector.load %arg2[%c256, %c0_4] : memref<384x128xf32, #tpu.memory_space<vmem>>, vector<128x128xf32>
    %cst = arith.constant dense<0.000000e+00> : vector<504x128xf32>
    %4 = tpu.matmul %0, %1, %cst {dimension_numbers = #tpu.dot_dimension_numbers<[1], [0], [0], [1], [0, 0, 1, 1], [], []>} : vector<504x4xf32>, vector<4x128xf32>, vector<504x128xf32> -> vector<504x128xf32>
    %c0_5 = arith.constant 0 : index
    %c0_6 = arith.constant 0 : index
    %5 = vector.load %arg3[%c0_5, %c0_6] : memref<3x128xf32, #tpu.memory_space<vmem>>, vector<1x128xf32>
    %6 = vector.broadcast %5 : vector<1x128xf32> to vector<504x128xf32>
    %7 = arith.addf %4, %6 : vector<504x128xf32>
    %cst_7 = arith.constant 0.000000e+00 : f32
    %8 = vector.broadcast %cst_7 : f32 to vector<504x128xf32>
    %9 = arith.maximumf %7, %8 : vector<504x128xf32>
    %cst_8 = arith.constant dense<0.000000e+00> : vector<504x128xf32>
    %10 = tpu.matmul %9, %2, %cst_8 {dimension_numbers = #tpu.dot_dimension_numbers<[1], [0], [0], [1], [0, 0, 1, 1], [], []>} : vector<504x128xf32>, vector<128x128xf32>, vector<504x128xf32> -> vector<504x128xf32>
    %c1 = arith.constant 1 : index
    %c0_9 = arith.constant 0 : index
    %11 = vector.load %arg3[%c1, %c0_9] : memref<3x128xf32, #tpu.memory_space<vmem>>, vector<1x128xf32>
    %12 = vector.broadcast %11 : vector<1x128xf32> to vector<504x128xf32>
    %13 = arith.addf %10, %12 : vector<504x128xf32>
    %cst_10 = arith.constant 0.000000e+00 : f32
    %14 = vector.broadcast %cst_10 : f32 to vector<504x128xf32>
    %15 = arith.maximumf %13, %14 : vector<504x128xf32>
    %cst_11 = arith.constant dense<0.000000e+00> : vector<504x128xf32>
    %16 = tpu.matmul %15, %3, %cst_11 {dimension_numbers = #tpu.dot_dimension_numbers<[1], [0], [0], [1], [0, 0, 1, 1], [], []>} : vector<504x128xf32>, vector<128x128xf32>, vector<504x128xf32> -> vector<504x128xf32>
    %c2 = arith.constant 2 : index
    %c0_12 = arith.constant 0 : index
    %17 = vector.load %arg3[%c2, %c0_12] : memref<3x128xf32, #tpu.memory_space<vmem>>, vector<1x128xf32>
    %18 = vector.broadcast %17 : vector<1x128xf32> to vector<504x128xf32>
    %19 = arith.addf %16, %18 : vector<504x128xf32>
    %c0_13 = arith.constant 0 : index
    %c0_14 = arith.constant 0 : index
    %20 = vector.load %arg4[%c0_13, %c0_14] : memref<504x128xf32, #tpu.memory_space<vmem>>, vector<504x128xf32>
    tpu.vector_store %arg4[%c0_13, %c0_14], %19 {strides = array<i32>} : memref<504x128xf32, #tpu.memory_space<vmem>>, vector<504x128xf32>,
    return
  }
  func.func @transform_0(%arg0: i32) -> (i32, i32) {
    %c0_i32 = arith.constant 0 : i32
    %c0_i32_0 = arith.constant 0 : i32
    return %arg0, %c0_i32 : i32, i32
  }
  func.func @transform_1(%arg0: i32) -> (i32, i32) {
    %c0_i32 = arith.constant 0 : i32
    %c0_i32_0 = arith.constant 0 : i32
    %c0_i32_1 = arith.constant 0 : i32
    return %c0_i32, %c0_i32_0 : i32, i32
  }
  func.func @transform_2(%arg0: i32) -> (i32, i32) {
    %c0_i32 = arith.constant 0 : i32
    %c0_i32_0 = arith.constant 0 : i32
    %c0_i32_1 = arith.constant 0 : i32
    return %c0_i32, %c0_i32_0 : i32, i32
  }
  func.func @transform_3(%arg0: i32) -> (i32, i32) {
    %c0_i32 = arith.constant 0 : i32
    %c0_i32_0 = arith.constant 0 : i32
    return %arg0, %c0_i32 : i32, i32
  }
}

</mosaic_0001>

<bundles_post_ra>
// kernel: tpu_custom_call.1
= control target key start
LH: loop header
LB: loop body
LE: loop exit
PB: predicated region body
PF: predicated region fallthrough
CT: control target
= control target key end

     0   :  { %vm306_vm0 = vcmask 1043456   ;;  %v2667_v2 = vmov 0.0   ;;  %vm2668_vm1 = vmmov 0   ;;  %vm116_vm2 = vcmask 31744   ;;  %s3749_s0 = inlined_call_operand.vmem [shape: f32[504,4], index: 0, kind: input, shape index: {}]   ;;  %s3750_s1 = inlined_call_operand.vmem [shape: f32[384,128], index: 1, kind: input, shape index: {}]   ;;  %s3751_s2 = inlined_call_operand.vmem [shape: f32[3,128], index: 2, kind: input, shape index: {}]   ;;  %s3752_s3 = inlined_call_operand.hbm [shape: f32[504,128], index: 3, kind: output, shape index: {}]  }
   0x1   :  { %v78_v0 = vld [vmem:[%s3750_s1] sm:$0xf]  ;;  %1954 = vmatprep.subr.mxu0 %v2667_v2  ;;  %1956 = vmatprep.mubr.msk.f32.mxu0 %vm2668_vm1, %v2667_v2  ;;  %v16_v3 = vld [vmem:[%s3749_s0 + $0x8] sm:$0xff]  ;;  %v2669_v4 = vmov 0.0|0.0   ;;  %v17_v5 = vld [vmem:[%s3749_s0 + $0x10] sm:$0xff] }
   0x2   :  { %v15_v1 = vld [vmem:[%s3749_s0] sm:$0xff]  ;;  %1955 = vmatpush3.msk.msra.mxu0 %vm306_vm0, %v78_v0  ;;  %2635 = vmatprep.subr.mxu1 %v2667_v2  ;;  %v80_v8 = vld [vmem:[%s3750_s1 + $0x88] sm:$0xff]  ;;  %v18_v11 = vld [vmem:[%s3749_s0 + $0x18] sm:$0xff] }
   0x3   :  { %1957 = vmatmul.mubr.msk.f32.vlgmr.msra.gmra.mrb[0].mxu0 %vm116_vm2, %v15_v1  ;;  %2636 = vmatpush3.msk.msra.mxu1 %vm306_vm0, %v78_v0  ;;  %v47_v6 = vld [vmem:[%s3749_s0 + $0x100] sm:$0xff]  ;;  %v48_v10 = vld [vmem:[%s3749_s0 + $0x108] sm:$0xff]  ;;  %v81_v12 = vld [vmem:[%s3750_s1 + $0x90] sm:$0xff] }
   0x4   :  { %1959 = vmatprep.mubr.msk.f32.mxu0 %vm2668_vm1, %v2667_v2  ;;  %2052 = vmatprep.mubr.msk.f32.mxu1 %vm2668_vm1, %v2667_v2  ;;  %v79_v7 = vld [vmem:[%s3750_s1 + $0x80] sm:$0xff]  ;;  %v82_v13 = vld [vmem:[%s3750_s1 + $0x98] sm:$0xff]  ;;  %v49_v15 = vld [vmem:[%s3749_s0 + $0x110] sm:$0xff] }
   0x5   :  { %2587 = vmatprep.subr.bf16.mxu1 %v2669_v4  ;;  %2611 = vmatprep.subr.bf16.mxu0 %v2669_v4  ;;  %v2588_v9 = vpack.c.bf16 %v80_v8, %v79_v7  ;;  %v2591_v14 = vpack.c.bf16 %v82_v13, %v81_v12  ;;  %v83_v16 = vld [vmem:[%s3750_s1 + $0xa0] sm:$0xff]  ;;  %v84_v17 = vld [vmem:[%s3750_s1 + $0xa8] sm:$0xff]  ;;  %v85_v20 = vld [vmem:[%s3750_s1 + $0xb0] sm:$0xff] }
   0x6   :  { %2053 = vmatmul.mubr.msk.f32.vlgmr.msra.gmra.mrb[0].mxu1 %vm116_vm2, %v47_v6  ;;  %v19_v18 = vld [vmem:[%s3749_s0 + $0x20] sm:$0xff]  ;;  %v2594_v19 = vpack.c.bf16 %v84_v17, %v83_v16  ;;  %v50_v21 = vld [vmem:[%s3749_s0 + $0x118] sm:$0xff]  ;;  %v20_v23 = vld [vmem:[%s3749_s0 + $0x28] sm:$0xff] }
   0x7   :  { %1960 = vmatmul.mubr.msk.f32.gmra.mrb[2].mxu0 %vm116_vm2, %v16_v3  ;;  %2055 = vmatprep.mubr.msk.f32.mxu1 %vm2668_vm1, %v2667_v2  ;;  %v86_v22 = vld [vmem:[%s3750_s1 + $0xb8] sm:$0xff]  ;;  %v87_v25 = vld [vmem:[%s3750_s1 + $0xc0] sm:$0xff]  ;;  %v88_v26 = vld [vmem:[%s3750_s1 + $0xc8] sm:$0xff] }
   0x8   :  { %1962 = vmatprep.mubr.msk.f32.mxu0 %vm2668_vm1, %v2667_v2  ;;  %2589 = vmatpush3.bf16.msra.mxu1 %v2588_v9  ;;  %v2597_v24 = vpack.c.bf16 %v86_v22, %v85_v20  ;;  %v51_v27 = vld [vmem:[%s3749_s0 + $0x120] sm:$0xff]  ;;  %v21_v28 = vld [vmem:[%s3749_s0 + $0x30] sm:$0xff]  ;;  %v2600_v29 = vpack.c.bf16 %v88_v26, %v87_v25  ;;  %v90_v31 = vld [vmem:[%s3750_s1 + $0xd8] sm:$0xff] }
   0x9   :  { %2590 = vmatprep.subr.bf16.mxu1 %v2669_v4  ;;  %v89_v30 = vld [vmem:[%s3750_s1 + $0xd0] sm:$0xff]  ;;  %v52_v32 = vld [vmem:[%s3749_s0 + $0x128] sm:$0xff] }
   0xa   :  { %2056 = vmatmul.mubr.msk.f32.gmra.mrb[2].mxu1 %vm116_vm2, %v48_v10 }
   0xb   :  { %1963 = vmatmul.mubr.msk.f32.gmra.mrb[4].mxu0 %vm116_vm2, %v17_v5  ;;  %2058 = vmatprep.mubr.msk.f32.mxu1 %vm2668_vm1, %v2667_v2 }
   0xc   :  { %1965 = vmatprep.mubr.msk.f32.mxu0 %vm2668_vm1, %v2667_v2  ;;  %2592 = vmatpush3.bf16.msra.mxu1 %v2591_v14 }
   0xd   :  { %2593 = vmatprep.subr.bf16.mxu1 %v2669_v4 }
   0xe   :  { %2059 = vmatmul.mubr.msk.f32.gmra.mrb[4].mxu1 %vm116_vm2, %v49_v15 }
   0xf   :  { %1966 = vmatmul.mubr.msk.f32.gmra.mrb[6].mxu0 %vm116_vm2, %v18_v11  ;;  %2061 = vmatprep.mubr.msk.f32.mxu1 %vm2668_vm1, %v2667_v2 }
  0x10   :  { %1968 = vmatprep.mubr.msk.f32.mxu0 %vm2668_vm1, %v2667_v2  ;;  %2595 = vmatpush3.bf16.msra.mxu1 %v2594_v19 }
  0x11   :  { %2596 = vmatprep.subr.bf16.mxu1 %v2669_v4 }
  0x12   :  { %2062 = vmatmul.mubr.msk.f32.gmra.mrb[6].mxu1 %vm116_vm2, %v50_v21 }
  0x13   :  { %1969 = vmatmul.mubr.msk.f32.gmra.mrb[8].mxu0 %vm116_vm2, %v19_v18  ;;  %2064 = vmatprep.mubr.msk.f32.mxu1 %vm2668_vm1, %v2667_v2 }
  0x14   :  { %1971 = vmatprep.mubr.msk.f32.mxu0 %vm2668_vm1, %v2667_v2  ;;  %2598 = vmatpush3.bf16.msra.mxu1 %v2597_v24 }
  0x15   :  { %2599 = vmatprep.subr.bf16.mxu1 %v2669_v4 }
  0x16   :  { %2065 = vmatmul.mubr.msk.f32.gmra.mrb[8].mxu1 %vm116_vm2, %v51_v27 }
  0x17   :  { %1972 = vmatmul.mubr.msk.f32.gmra.mrb[10].mxu0 %vm116_vm2, %v20_v23  ;;  %2067 = vmatprep.mubr.msk.f32.mxu1 %vm2668_vm1, %v2667_v2 }
  0x18   :  { %1974 = vmatprep.mubr.msk.f32.mxu0 %vm2668_vm1, %v2667_v2 }
  0x1b   :  { %1975 = vmatmul.mubr.msk.f32.gmra.mrb[12].mxu0 %vm116_vm2, %v21_v28 }
  0x1c   :  { %8 = vsyncpa [#allocation3], 0  ;;  %1977 = vmatprep.mubr.msk.f32.mxu0 %vm2668_vm1, %v2667_v2  ;;  %v22_v33 = vld [vmem:[%s3749_s0 + $0x38] sm:$0xff]  ;;  %2601 = vmatpush3.bf16.msra.mxu1 %v2600_v29  ;;  %v2603_v34 = vpack.c.bf16 %v90_v31, %v89_v30  ;;  %v91_v35 = vld [vmem:[%s3750_s1 + $0xe0] sm:$0xff] }
  0x1d   :  { %2068 = vmatmul.mubr.msk.f32.gmra.mrb[10].mxu1 %vm116_vm2, %v52_v32  ;;  %2602 = vmatprep.subr.bf16.mxu1 %v2669_v4  ;;  %v92_v36 = vld [vmem:[%s3750_s1 + $0xe8] sm:$0xff]  ;;  %v53_v37 = vld [vmem:[%s3749_s0 + $0x130] sm:$0xff]  ;;  %v23_v38 = vld [vmem:[%s3749_s0 + $0x40] sm:$0xff] }
  0x1e   :  { %2070 = vmatprep.mubr.msk.f32.mxu1 %vm2668_vm1, %v2667_v2  ;;  %v2606_v39 = vpack.c.bf16 %v92_v36, %v91_v35  ;;  %v93_v40 = vld [vmem:[%s3750_s1 + $0xf0] sm:$0xff]  ;;  %v94_v41 = vld [vmem:[%s3750_s1 + $0xf8] sm:$0xff]  ;;  %v24_v43 = vld [vmem:[%s3749_s0 + $0x48] sm:$0xff] }
  0x1f   :  { %1978 = vmatmul.mubr.msk.f32.gmra.mrb[14].mxu0 %vm116_vm2, %v22_v33  ;;  %v54_v42 = vld [vmem:[%s3749_s0 + $0x138] sm:$0xff]  ;;  %v2609_v44 = vpack.c.bf16 %v94_v41, %v93_v40  ;;  %v55_v45 = vld [vmem:[%s3749_s0 + $0x140] sm:$0xff]  ;;  %v25_v46 = vld [vmem:[%s3749_s0 + $0x50] sm:$0xff] }
  0x20   :  { %1980 = vmatprep.mubr.msk.f32.mxu0 %vm2668_vm1, %v2667_v2  ;;  %2604 = vmatpush3.bf16.msra.mxu1 %v2603_v34  ;;  %v56_v47 = vld [vmem:[%s3749_s0 + $0x148] sm:$0xff]  ;;  %v26_v48 = vld [vmem:[%s3749_s0 + $0x58] sm:$0xff]  ;;  %v57_v49 = vld [vmem:[%s3749_s0 + $0x150] sm:$0xff] }
  0x21   :  { %2071 = vmatmul.mubr.msk.f32.gmra.mrb[12].mxu1 %vm116_vm2, %v53_v37  ;;  %2605 = vmatprep.subr.bf16.mxu1 %v2669_v4  ;;  %v27_v50 = vld [vmem:[%s3749_s0 + $0x60] sm:$0xff]  ;;  %v58_v51 = vld [vmem:[%s3749_s0 + $0x158] sm:$0xff]  ;;  %v28_v52 = vld [vmem:[%s3749_s0 + $0x68] sm:$0xff] }
  0x22   :  { %2073 = vmatprep.mubr.msk.f32.mxu1 %vm2668_vm1, %v2667_v2  ;;  %v59_v53 = vld [vmem:[%s3749_s0 + $0x160] sm:$0xff]  ;;  %v29_v54 = vld [vmem:[%s3749_s0 + $0x70] sm:$0xff]  ;;  %v60_v55 = vld [vmem:[%s3749_s0 + $0x168] sm:$0xff] }
  0x23   :  { %1981 = vmatmul.mubr.msk.f32.gmra.mrb[16].mxu0 %vm116_vm2, %v23_v38  ;;  %v30_v56 = vld [vmem:[%s3749_s0 + $0x78] sm:$0xff]  ;;  %v61_v57 = vld [vmem:[%s3749_s0 + $0x170] sm:$0xff]  ;;  %v31_v58 = vld [vmem:[%s3749_s0 + $0x80] sm:$0xff] }
  0x24   :  { %1983 = vmatprep.mubr.msk.f32.mxu0 %vm2668_vm1, %v2667_v2  ;;  %2607 = vmatpush3.bf16.msra.mxu1 %v2606_v39  ;;  %v62_v59 = vld [vmem:[%s3749_s0 + $0x178] sm:$0xff]  ;;  %v32_v60 = vld [vmem:[%s3749_s0 + $0x88] sm:$0xff]  ;;  %v63_v61 = vld [vmem:[%s3749_s0 + $0x180] sm:$0xff] }
  0x25   :  { %2074 = vmatmul.mubr.msk.f32.gmra.mrb[14].mxu1 %vm116_vm2, %v54_v42  ;;  %2608 = vmatprep.subr.bf16.mxu1 %v2669_v4  ;;  %v33_v62 = vld [vmem:[%s3749_s0 + $0x90] sm:$0xff]  ;;  %v64_v63 = vld [vmem:[%s3749_s0 + $0x188] sm:$0xff]  ;;  %v34_v0 = vld [vmem:[%s3749_s0 + $0x98] sm:$0xff] }
  0x26   :  { %2076 = vmatprep.mubr.msk.f32.mxu1 %vm2668_vm1, %v2667_v2  ;;  %v65_v1 = vld [vmem:[%s3749_s0 + $0x190] sm:$0xff]  ;;  %v35_v3 = vld [vmem:[%s3749_s0 + $0xa0] sm:$0xff]  ;;  %v66_v5 = vld [vmem:[%s3749_s0 + $0x198] sm:$0xff] }
  0x27   :  { %1984 = vmatmul.mubr.msk.f32.gmra.mrb[18].mxu0 %vm116_vm2, %v24_v43  ;;  %v36_v6 = vld [vmem:[%s3749_s0 + $0xa8] sm:$0xff]  ;;  %v67_v7 = vld [vmem:[%s3749_s0 + $0x1a0] sm:$0xff]  ;;  %v37_v8 = vld [vmem:[%s3749_s0 + $0xb0] sm:$0xff] }
  0x28   :  { %1986 = vmatprep.mubr.msk.f32.mxu0 %vm2668_vm1, %v2667_v2  ;;  %2610 = vmatpush3.bf16.msra.mxu1 %v2609_v44  ;;  %v68_v9 = vld [vmem:[%s3749_s0 + $0x1a8] sm:$0xff]  ;;  %v38_v10 = vld [vmem:[%s3749_s0 + $0xb8] sm:$0xff]  ;;  %v69_v11 = vld [vmem:[%s3749_s0 + $0x1b0] sm:$0xff] }
  0x29   :  { %2077 = vmatmul.mubr.msk.f32.gmra.mrb[16].mxu1 %vm116_vm2, %v55_v45  ;;  %v39_v12 = vld [vmem:[%s3749_s0 + $0xc0] sm:$0xff]  ;;  %v70_v13 = vld [vmem:[%s3749_s0 + $0x1b8] sm:$0xff]  ;;  %v40_v14 = vld [vmem:[%s3749_s0 + $0xc8] sm:$0xff] }
  0x2a   :  { %2079 = vmatprep.mubr.msk.f32.mxu1 %vm2668_vm1, %v2667_v2  ;;  %v71_v15 = vld [vmem:[%s3749_s0 + $0x1c0] sm:$0xff]  ;;  %v41_v16 = vld [vmem:[%s3749_s0 + $0xd0] sm:$0xff]  ;;  %v72_v17 = vld [vmem:[%s3749_s0 + $0x1c8] sm:$0xff] }
  0x2b   :  { %1987 = vmatmul.mubr.msk.f32.gmra.mrb[20].mxu0 %vm116_vm2, %v25_v46  ;;  %v42_v18 = vld [vmem:[%s3749_s0 + $0xd8] sm:$0xff]  ;;  %v73_v19 = vld [vmem:[%s3749_s0 + $0x1d0] sm:$0xff]  ;;  %v43_v20 = vld [vmem:[%s3749_s0 + $0xe0] sm:$0xff] }
  0x2c   :  { %1989 = vmatprep.mubr.msk.f32.mxu0 %vm2668_vm1, %v2667_v2  ;;  %v74_v21 = vld [vmem:[%s3749_s0 + $0x1d8] sm:$0xff]  ;;  %v44_v22 = vld [vmem:[%s3749_s0 + $0xe8] sm:$0xff]  ;;  %v75_v23 = vld [vmem:[%s3749_s0 + $0x1e0] sm:$0xff] }
  0x2d   :  { %2080 = vmatmul.mubr.msk.f32.gmra.mrb[18].mxu1 %vm116_vm2, %v56_v47  ;;  %v45_v24 = vld [vmem:[%s3749_s0 + $0xf0] sm:$0xff]  ;;  %v76_v25 = vld [vmem:[%s3749_s0 + $0x1e8] sm:$0xff]  ;;  %v46_v26 = vld [vmem:[%s3749_s0 + $0xf8] sm:$0xff] }
  0x2e   :  { %2082 = vmatprep.mubr.msk.f32.mxu1 %vm2668_vm1, %v2667_v2  ;;  %v77_v27 = vld [vmem:[%s3749_s0 + $0x1f0] sm:$0xff]  ;;  %v95_v28 = vld [vmem:[%s3750_s1 + $0x100] sm:$0xff]  ;;  %v96_v29 = vld [vmem:[%s3750_s1 + $0x108] sm:$0xff] }
  0x2f   :  { %1990 = vmatmul.mubr.msk.f32.gmra.mrb[22].mxu0 %vm116_vm2, %v26_v48  ;;  %v2612_v30 = vpack.c.bf16 %v96_v29, %v95_v28  ;;  %v97_v31 = vld [vmem:[%s3750_s1 + $0x110] sm:$0xff]  ;;  %v98_v32 = vld [vmem:[%s3750_s1 + $0x118] sm:$0xff]  ;;  %v3154_v34 = vld [vmem:[%s3751_s2] ss:$0 sm:$0xff] }
  0x30   :  { %1992 = vmatprep.mubr.msk.f32.mxu0 %vm2668_vm1, %v2667_v2  ;;  %v2615_v33 = vpack.c.bf16 %v98_v32, %v97_v31  ;;  %v99_v35 = vld [vmem:[%s3750_s1 + $0x120] sm:$0xff]  ;;  %v100_v36 = vld [vmem:[%s3750_s1 + $0x128] sm:$0xff] }
  0x31   :  { %2083 = vmatmul.mubr.msk.f32.gmra.mrb[20].mxu1 %vm116_vm2, %v57_v49  ;;  %2613 = vmatpush3.bf16.msra.mxu0 %v2612_v30  ;;  %v2618_v38 = vpack.c.bf16 %v100_v36, %v99_v35 }
  0x32   :  { %2085 = vmatprep.mubr.msk.f32.mxu1 %vm2668_vm1, %v2667_v2  ;;  %2614 = vmatprep.subr.bf16.mxu0 %v2669_v4 }
  0x33   :  { %1993 = vmatmul.mubr.msk.f32.gmra.mrb[24].mxu0 %vm116_vm2, %v27_v50 }
  0x34   :  { %1995 = vmatprep.mubr.msk.f32.mxu0 %vm2668_vm1, %v2667_v2 }
  0x35   :  { %2086 = vmatmul.mubr.msk.f32.gmra.mrb[22].mxu1 %vm116_vm2, %v58_v51  ;;  %2616 = vmatpush3.bf16.msra.mxu0 %v2615_v33 }
  0x36   :  { %2088 = vmatprep.mubr.msk.f32.mxu1 %vm2668_vm1, %v2667_v2  ;;  %2617 = vmatprep.subr.bf16.mxu0 %v2669_v4 }
  0x37   :  { %1996 = vmatmul.mubr.msk.f32.gmra.mrb[26].mxu0 %vm116_vm2, %v28_v52 }
  0x38   :  { %1998 = vmatprep.mubr.msk.f32.mxu0 %vm2668_vm1, %v2667_v2 }
  0x39   :  { %2089 = vmatmul.mubr.msk.f32.gmra.mrb[24].mxu1 %vm116_vm2, %v59_v53  ;;  %2619 = vmatpush3.bf16.msra.mxu0 %v2618_v38 }
  0x3a   :  { %2091 = vmatprep.mubr.msk.f32.mxu1 %vm2668_vm1, %v2667_v2  ;;  %2620 = vmatprep.subr.bf16.mxu0 %v2669_v4 }
  0x3b   :  { %1999 = vmatmul.mubr.msk.f32.gmra.mrb[28].mxu0 %vm116_vm2, %v29_v54 }
  0x3c   :  { %2001 = vmatprep.mubr.msk.f32.mxu0 %vm2668_vm1, %v2667_v2 }
  0x3d   :  { %2092 = vmatmul.mubr.msk.f32.gmra.mrb[26].mxu1 %vm116_vm2, %v60_v55 }
  0x3e   :  { %2094 = vmatprep.mubr.msk.f32.mxu1 %vm2668_vm1, %v2667_v2 }
  0x3f   :  { %2002 = vmatmul.mubr.msk.f32.gmra.mrb[30].mxu0 %vm116_vm2, %v30_v56 }
  0x40   :  { %2004 = vmatprep.mubr.msk.f32.mxu0 %vm2668_vm1, %v2667_v2 }
  0x41   :  { %2095 = vmatmul.mubr.msk.f32.gmra.mrb[28].mxu1 %vm116_vm2, %v61_v57  ;;  %v101_v57 = vld [vmem:[%s3750_s1 + $0x130] sm:$0xff] }
  0x42   :  { %2097 = vmatprep.mubr.msk.f32.mxu1 %vm2668_vm1, %v2667_v2 }
  0x43   :  { %2005 = vmatmul.mubr.msk.f32.gmra.mrb[32].mxu0 %vm116_vm2, %v31_v58  ;;  %v102_v58 = vld [vmem:[%s3750_s1 + $0x138] sm:$0xff] }
  0x44   :  { %2007 = vmatprep.mubr.msk.f32.mxu0 %vm2668_vm1, %v2667_v2 }
  0x45   :  { %2098 = vmatmul.mubr.msk.f32.gmra.mrb[30].mxu1 %vm116_vm2, %v62_v59 }
  0x46   :  { %2100 = vmatprep.mubr.msk.f32.mxu1 %vm2668_vm1, %v2667_v2 }
  0x47   :  { %2008 = vmatmul.mubr.msk.f32.gmra.mrb[34].mxu0 %vm116_vm2, %v32_v60  ;;  %v2621_v60 = vpack.c.bf16 %v102_v58, %v101_v57 }
  0x48   :  { %2010 = vmatprep.mubr.msk.f32.mxu0 %vm2668_vm1, %v2667_v2 }
  0x49   :  { %2101 = vmatmul.mubr.msk.f32.gmra.mrb[32].mxu1 %vm116_vm2, %v63_v61  ;;  %2622 = vmatpush3.bf16.msra.mxu0 %v2621_v60 }
  0x4a   :  { %2103 = vmatprep.mubr.msk.f32.mxu1 %vm2668_vm1, %v2667_v2  ;;  %2623 = vmatprep.subr.bf16.mxu0 %v2669_v4 }
  0x4b   :  { %2011 = vmatmul.mubr.msk.f32.gmra.mrb[36].mxu0 %vm116_vm2, %v33_v62 }
  0x4c   :  { %2013 = vmatprep.mubr.msk.f32.mxu0 %vm2668_vm1, %v2667_v2 }
  0x4d   :  { %2104 = vmatmul.mubr.msk.f32.gmra.mrb[34].mxu1 %vm116_vm2, %v64_v63 }
  0x4e   :  { %2106 = vmatprep.mubr.msk.f32.mxu1 %vm2668_vm1, %v2667_v2 }
  0x4f   :  { %2014 = vmatmul.mubr.msk.f32.gmra.mrb[38].mxu0 %vm116_vm2, %v34_v0 }
  0x50   :  { %2016 = vmatprep.mubr.msk.f32.mxu0 %vm2668_vm1, %v2667_v2 }
  0x51   :  { %2107 = vmatmul.mubr.msk.f32.gmra.mrb[36].mxu1 %vm116_vm2, %v65_v1 }
  0x52   :  { %2109 = vmatprep.mubr.msk.f32.mxu1 %vm2668_vm1, %v2667_v2 }
  0x53   :  { %2017 = vmatmul.mubr.msk.f32.gmra.mrb[40].mxu0 %vm116_vm2, %v35_v3 }
  0x54   :  { %2019 = vmatprep.mubr.msk.f32.mxu0 %vm2668_vm1, %v2667_v2 }
  0x55   :  { %2110 = vmatmul.mubr.msk.f32.gmra.mrb[38].mxu1 %vm116_vm2, %v66_v5 }
  0x56   :  { %2112 = vmatprep.mubr.msk.f32.mxu1 %vm2668_vm1, %v2667_v2 }
  0x57   :  { %2020 = vmatmul.mubr.msk.f32.gmra.mrb[42].mxu0 %vm116_vm2, %v36_v6 }
  0x58   :  { %2022 = vmatprep.mubr.msk.f32.mxu0 %vm2668_vm1, %v2667_v2 }
  0x59   :  { %2113 = vmatmul.mubr.msk.f32.gmra.mrb[40].mxu1 %vm116_vm2, %v67_v7 }
  0x5a   :  { %2115 = vmatprep.mubr.msk.f32.mxu1 %vm2668_vm1, %v2667_v2 }
  0x5b   :  { %2023 = vmatmul.mubr.msk.f32.gmra.mrb[44].mxu0 %vm116_vm2, %v37_v8 }
  0x5c   :  { %2025 = vmatprep.mubr.msk.f32.mxu0 %vm2668_vm1, %v2667_v2 }
  0x5d   :  { %2116 = vmatmul.mubr.msk.f32.gmra.mrb[42].mxu1 %vm116_vm2, %v68_v9 }
  0x5e   :  { %2118 = vmatprep.mubr.msk.f32.mxu1 %vm2668_vm1, %v2667_v2 }
  0x5f   :  { %2026 = vmatmul.mubr.msk.f32.gmra.mrb[46].mxu0 %vm116_vm2, %v38_v10 }
  0x60   :  { %2028 = vmatprep.mubr.msk.f32.mxu0 %vm2668_vm1, %v2667_v2 }
  0x61   :  { %2119 = vmatmul.mubr.msk.f32.gmra.mrb[44].mxu1 %vm116_vm2, %v69_v11 }
  0x62   :  { %2121 = vmatprep.mubr.msk.f32.mxu1 %vm2668_vm1, %v2667_v2 }
  0x63   :  { %2029 = vmatmul.mubr.msk.f32.gmra.mrb[48].mxu0 %vm116_vm2, %v39_v12 }
  0x64   :  { %2031 = vmatprep.mubr.msk.f32.mxu0 %vm2668_vm1, %v2667_v2 }
  0x65   :  { %2122 = vmatmul.mubr.msk.f32.gmra.mrb[46].mxu1 %vm116_vm2, %v70_v13 }
  0x66   :  { %2124 = vmatprep.mubr.msk.f32.mxu1 %vm2668_vm1, %v2667_v2 }
  0x67   :  { %2032 = vmatmul.mubr.msk.f32.gmra.mrb[50].mxu0 %vm116_vm2, %v40_v14 }
  0x68   :  { %2034 = vmatprep.mubr.msk.f32.mxu0 %vm2668_vm1, %v2667_v2 }
  0x69   :  { %2125 = vmatmul.mubr.msk.f32.gmra.mrb[48].mxu1 %vm116_vm2, %v71_v15 }
  0x6a   :  { %2127 = vmatprep.mubr.msk.f32.mxu1 %vm2668_vm1, %v2667_v2 }
  0x6b   :  { %2035 = vmatmul.mubr.msk.f32.gmra.mrb[52].mxu0 %vm116_vm2, %v41_v16 }
  0x6c   :  { %2037 = vmatprep.mubr.msk.f32.mxu0 %vm2668_vm1, %v2667_v2 }
  0x6d   :  { %2128 = vmatmul.mubr.msk.f32.gmra.mrb[50].mxu1 %vm116_vm2, %v72_v17 }
  0x6e   :  { %2130 = vmatprep.mubr.msk.f32.mxu1 %vm2668_vm1, %v2667_v2 }
  0x6f   :  { %2038 = vmatmul.mubr.msk.f32.gmra.mrb[54].mxu0 %vm116_vm2, %v42_v18 }
  0x70   :  { %2040 = vmatprep.mubr.msk.f32.mxu0 %vm2668_vm1, %v2667_v2 }
  0x71   :  { %2131 = vmatmul.mubr.msk.f32.gmra.mrb[52].mxu1 %vm116_vm2, %v73_v19 }
  0x72   :  { %2133 = vmatprep.mubr.msk.f32.mxu1 %vm2668_vm1, %v2667_v2 }
  0x73   :  { %2041 = vmatmul.mubr.msk.f32.gmra.mrb[56].mxu0 %vm116_vm2, %v43_v20 }
  0x74   :  { %2043 = vmatprep.mubr.msk.f32.mxu0 %vm2668_vm1, %v2667_v2 }
  0x75   :  { %2134 = vmatmul.mubr.msk.f32.gmra.mrb[54].mxu1 %vm116_vm2, %v74_v21 }
  0x76   :  { %2136 = vmatprep.mubr.msk.f32.mxu1 %vm2668_vm1, %v2667_v2 }
  0x77   :  { %2044 = vmatmul.mubr.msk.f32.gmra.mrb[58].mxu0 %vm116_vm2, %v44_v22  ;;  %v103_v22 = vld [vmem:[%s3750_s1 + $0x140] sm:$0xff] }
  0x78   :  { %2046 = vmatprep.mubr.msk.f32.mxu0 %vm2668_vm1, %v2667_v2 }
  0x79   :  { %2137 = vmatmul.mubr.msk.f32.gmra.mrb[56].mxu1 %vm116_vm2, %v75_v23  ;;  %v104_v23 = vld [vmem:[%s3750_s1 + $0x148] sm:$0xff] }
  0x7a   :  { %2139 = vmatprep.mubr.msk.f32.mxu1 %vm2668_vm1, %v2667_v2 }
  0x7b   :  { %2047 = vmatmul.mubr.msk.f32.gmra.mrb[60].mxu0 %vm116_vm2, %v45_v24 }
  0x7c   :  { %2049 = vmatprep.mubr.msk.f32.mxu0 %vm2668_vm1, %v2667_v2 }
  0x7d   :  { %2140 = vmatmul.mubr.msk.f32.gmra.mrb[58].mxu1 %vm116_vm2, %v76_v25  ;;  %v2624_v25 = vpack.c.bf16 %v104_v23, %v103_v22  ;;  %v108_v22 = vld [vmem:[%s3750_s1 + $0x168] sm:$0xff] }
  0x7e   :  { %2142 = vmatprep.mubr.msk.f32.mxu1 %vm2668_vm1, %v2667_v2 }
  0x7f   :  { %2050 = vmatmul.mubr.msk.f32.gmra.mrb[62].mxu0 %vm116_vm2, %v46_v26 }
  0x80   :  { %2398 = vmatprep.mubr.msk.f32.mxu0 %vm2668_vm1, %v2667_v2  ;;  %2625 = vmatpush3.bf16.msra.mxu0 %v2624_v25 }
  0x81   :  { %2143 = vmatmul.mubr.msk.f32.gmra.mrb[60].mxu1 %vm116_vm2, %v77_v27  ;;  %2626 = vmatprep.subr.bf16.mxu0 %v2669_v4 }
  0x82   :  { %2177 = vmatprep.mubr.msk.f32.mxu1 %vm2668_vm1, %v2667_v2 }
  0xd6   :  { %v376_v37 = vpop.f32.mrb[0].mxu0 }
  0xd7   :  { %v377_v39 = vadd.f32 %v3154_v34, %v376_v37  ;;  %v1958_v40 = vpop.f32.mrb[1].mxu0 }
  0xd9   :  { %v690_v41 = vmax.f32 %v377_v39, 0.0  ;;  %v3167_v45 = vpop.f32.mrb[0].mxu1 }
  0xda   :  { %v381_v42 = vpop.f32.mrb[2].mxu0  ;;  %v2054_v47 = vpop.f32.mrb[1].mxu1 }
  0xdb   :  { %v382_v43 = vadd.f32 %v3154_v34, %v381_v42  ;;  %v1961_v44 = vpop.f32.mrb[3].mxu0  ;;  %2178 = vmatmul.mubr.f32.vlgmr.msra.gmra.mrb[62].mxu1 %v690_v41 }
  0xdc   :  { %2180 = vmatprep.mubr.msk.f32.mxu1 %vm2668_vm1, %v2667_v2 }
  0xdd   :  { %v691_v46 = vmax.f32 %v382_v43, 0.0  ;;  %v3172_v51 = vpop.f32.mrb[2].mxu1 }
  0xde   :  { %v386_v48 = vpop.f32.mrb[4].mxu0  ;;  %v2057_v53 = vpop.f32.mrb[3].mxu1 }
  0xdf   :  { %v387_v49 = vadd.f32 %v3154_v34, %v386_v48  ;;  %v1964_v50 = vpop.f32.mrb[5].mxu0  ;;  %2181 = vmatmul.mubr.f32.gmra.mrb[64].mxu1 %v691_v46  ;;  %v106_v53 = vld [vmem:[%s3750_s1 + $0x158] sm:$0xff] }
  0xe0   :  { %2183 = vmatprep.mubr.msk.f32.mxu1 %vm2668_vm1, %v2667_v2 }
  0xe1   :  { %v692_v52 = vmax.f32 %v387_v49, 0.0  ;;  %v3183_v59 = vpop.f32.mrb[4].mxu1 }
  0xe2   :  { %v391_v54 = vpop.f32.mrb[6].mxu0  ;;  %v2060_v62 = vpop.f32.mrb[5].mxu1 }
  0xe3   :  { %v392_v55 = vadd.f32 %v3154_v34, %v391_v54  ;;  %v1967_v56 = vpop.f32.mrb[7].mxu0  ;;  %2184 = vmatmul.mubr.f32.gmra.mrb[66].mxu1 %v692_v52  ;;  %v105_v52 = vld [vmem:[%s3750_s1 + $0x150] sm:$0xff] }
  0xe4   :  { %2186 = vmatprep.mubr.msk.f32.mxu1 %vm2668_vm1, %v2667_v2 }
  0xe5   :  { %v693_v61 = vmax.f32 %v392_v55, 0.0  ;;  %v3189_v3 = vpop.f32.mrb[6].mxu1  ;;  %v2627_v55 = vpack.c.bf16 %v106_v53, %v105_v52 }
  0xe6   :  { %v396_v63 = vpop.f32.mrb[8].mxu0  ;;  %v2063_v6 = vpop.f32.mrb[7].mxu1 }
  0xe7   :  { %v397_v0 = vadd.f32 %v3154_v34, %v396_v63  ;;  %v1970_v1 = vpop.f32.mrb[9].mxu0  ;;  %2187 = vmatmul.mubr.f32.gmra.mrb[68].mxu1 %v693_v61  ;;  %2628 = vmatpush3.bf16.msra.mxu0 %v2627_v55  ;;  %v109_v55 = vld [vmem:[%s3750_s1 + $0x170] sm:$0xff] }
  0xe8   :  { %2189 = vmatprep.mubr.msk.f32.mxu1 %vm2668_vm1, %v2667_v2  ;;  %2629 = vmatprep.subr.bf16.mxu0 %v2669_v4 }
  0xe9   :  { %v694_v5 = vmax.f32 %v397_v0, 0.0  ;;  %v3194_v10 = vpop.f32.mrb[8].mxu1 }
  0xea   :  { %v401_v7 = vpop.f32.mrb[10].mxu0  ;;  %v2066_v12 = vpop.f32.mrb[9].mxu1 }
  0xeb   :  { %v402_v8 = vadd.f32 %v3154_v34, %v401_v7  ;;  %v1973_v9 = vpop.f32.mrb[11].mxu0  ;;  %2190 = vmatmul.mubr.f32.gmra.mrb[70].mxu1 %v694_v5 }
  0xec   :  { %2192 = vmatprep.mubr.msk.f32.mxu1 %vm2668_vm1, %v2667_v2 }
  0xed   :  { %v695_v11 = vmax.f32 %v402_v8, 0.0 }
  0xee   :  { %v406_v13 = vpop.f32.mrb[12].mxu0 }
  0xef   :  { %v407_v14 = vadd.f32 %v3154_v34, %v406_v13  ;;  %v1976_v15 = vpop.f32.mrb[13].mxu0  ;;  %2193 = vmatmul.mubr.f32.gmra.mrb[72].mxu1 %v695_v11 }
  0xf0   :  { %2195 = vmatprep.mubr.msk.f32.mxu1 %vm2668_vm1, %v2667_v2  ;;  %v3199_v16 = vpop.f32.mrb[10].mxu1 }
  0xf1   :  { %v696_v17 = vmax.f32 %v407_v14, 0.0  ;;  %v2069_v18 = vpop.f32.mrb[11].mxu1 }
  0xf2   :  { %v411_v19 = vpop.f32.mrb[14].mxu0 }
  0xf3   :  { %v412_v20 = vadd.f32 %v3154_v34, %v411_v19  ;;  %v1979_v21 = vpop.f32.mrb[15].mxu0  ;;  %2196 = vmatmul.mubr.f32.gmra.mrb[74].mxu1 %v696_v17 }
  0xf4   :  { %2198 = vmatprep.mubr.msk.f32.mxu1 %vm2668_vm1, %v2667_v2  ;;  %v3210_v24 = vpop.f32.mrb[12].mxu1  ;;  %v107_v21 = vld [vmem:[%s3750_s1 + $0x160] sm:$0xff] }
  0xf5   :  { %v697_v26 = vmax.f32 %v412_v20, 0.0  ;;  %v2072_v27 = vpop.f32.mrb[13].mxu1  ;;  %v2630_v25 = vpack.c.bf16 %v108_v22, %v107_v21 }
  0xf6   :  { %v416_v28 = vpop.f32.mrb[16].mxu0 }
  0xf7   :  { %v417_v29 = vadd.f32 %v3154_v34, %v416_v28  ;;  %v1982_v30 = vpop.f32.mrb[17].mxu0  ;;  %2199 = vmatmul.mubr.f32.gmra.mrb[76].mxu1 %v697_v26  ;;  %2631 = vmatpush3.bf16.msra.mxu0 %v2630_v25 }
  0xf8   :  { %2201 = vmatprep.mubr.msk.f32.mxu1 %vm2668_vm1, %v2667_v2  ;;  %v3216_v31 = vpop.f32.mrb[14].mxu1  ;;  %2632 = vmatprep.subr.bf16.mxu0 %v2669_v4 }
  0xf9   :  { %v698_v32 = vmax.f32 %v417_v29, 0.0  ;;  %v2075_v33 = vpop.f32.mrb[15].mxu1 }
  0xfa   :  { %v421_v35 = vpop.f32.mrb[18].mxu0 }
  0xfb   :  { %v422_v36 = vadd.f32 %v3154_v34, %v421_v35  ;;  %v1985_v37 = vpop.f32.mrb[19].mxu0  ;;  %2202 = vmatmul.mubr.f32.gmra.mrb[78].mxu1 %v698_v32 }
  0xfc   :  { %2204 = vmatprep.mubr.msk.f32.mxu1 %vm2668_vm1, %v2667_v2  ;;  %v3221_v38 = vpop.f32.mrb[16].mxu1 }
  0xfd   :  { %v699_v39 = vmax.f32 %v422_v36, 0.0  ;;  %v2078_v40 = vpop.f32.mrb[17].mxu1 }
  0xfe   :  { %v426_v41 = vpop.f32.mrb[20].mxu0 }
  0xff   :  { %v427_v42 = vadd.f32 %v3154_v34, %v426_v41  ;;  %v1988_v43 = vpop.f32.mrb[21].mxu0  ;;  %2205 = vmatmul.mubr.f32.gmra.mrb[80].mxu1 %v699_v39 }
 0x100   :  { %2207 = vmatprep.mubr.msk.f32.mxu1 %vm2668_vm1, %v2667_v2  ;;  %v3226_v44 = vpop.f32.mrb[18].mxu1 }
 0x101   :  { %v700_v46 = vmax.f32 %v427_v42, 0.0  ;;  %v2081_v47 = vpop.f32.mrb[19].mxu1 }
 0x102   :  { %v431_v48 = vpop.f32.mrb[22].mxu0 }
 0x103   :  { %v432_v49 = vadd.f32 %v3154_v34, %v431_v48  ;;  %v1991_v50 = vpop.f32.mrb[23].mxu0  ;;  %2208 = vmatmul.mubr.f32.gmra.mrb[82].mxu1 %v700_v46 }
 0x104   :  { %2210 = vmatprep.mubr.msk.f32.mxu1 %vm2668_vm1, %v2667_v2  ;;  %v3237_v54 = vpop.f32.mrb[20].mxu1 }
 0x105   :  { %v701_v56 = vmax.f32 %v432_v49, 0.0  ;;  %v2084_v57 = vpop.f32.mrb[21].mxu1 }
 0x106   :  { %v436_v58 = vpop.f32.mrb[24].mxu0 }
 0x107   :  { %v437_v60 = vadd.f32 %v3154_v34, %v436_v58  ;;  %v1994_v61 = vpop.f32.mrb[25].mxu0  ;;  %2211 = vmatmul.mubr.f32.gmra.mrb[84].mxu1 %v701_v56  ;;  %v110_v56 = vld [vmem:[%s3750_s1 + $0x178] sm:$0xff] }
 0x108   :  { %2213 = vmatprep.mubr.msk.f32.mxu1 %vm2668_vm1, %v2667_v2  ;;  %v3243_v62 = vpop.f32.mrb[22].mxu1  ;;  %v2633_v58 = vpack.c.bf16 %v110_v56, %v109_v55 }
 0x109   :  { %v702_v63 = vmax.f32 %v437_v60, 0.0  ;;  %v2087_v0 = vpop.f32.mrb[23].mxu1 }
 0x10a   :  { %v441_v1 = vpop.f32.mrb[26].mxu0  ;;  %2634 = vmatpush3.bf16.msra.mxu0 %v2633_v58 }
 0x10b   :  { %v442_v5 = vadd.f32 %v3154_v34, %v441_v1  ;;  %v1997_v6 = vpop.f32.mrb[27].mxu0  ;;  %2214 = vmatmul.mubr.f32.gmra.mrb[86].mxu1 %v702_v63 }
 0x10c   :  { %2216 = vmatprep.mubr.msk.f32.mxu1 %vm2668_vm1, %v2667_v2  ;;  %v3248_v7 = vpop.f32.mrb[24].mxu1 }
 0x10d   :  { %v703_v8 = vmax.f32 %v442_v5, 0.0  ;;  %v2090_v9 = vpop.f32.mrb[25].mxu1 }
 0x10e   :  { %v446_v11 = vpop.f32.mrb[28].mxu0 }
 0x10f   :  { %v447_v12 = vadd.f32 %v3154_v34, %v446_v11  ;;  %v2000_v13 = vpop.f32.mrb[29].mxu0  ;;  %2217 = vmatmul.mubr.f32.gmra.mrb[88].mxu1 %v703_v8 }
 0x110   :  { %2219 = vmatprep.mubr.msk.f32.mxu1 %vm2668_vm1, %v2667_v2  ;;  %v3253_v14 = vpop.f32.mrb[26].mxu1 }
 0x111   :  { %v704_v15 = vmax.f32 %v447_v12, 0.0  ;;  %v2093_v17 = vpop.f32.mrb[27].mxu1 }
 0x112   :  { %v451_v18 = vpop.f32.mrb[30].mxu0 }
 0x113   :  { %v452_v19 = vadd.f32 %v3154_v34, %v451_v18  ;;  %v2003_v20 = vpop.f32.mrb[31].mxu0  ;;  %2220 = vmatmul.mubr.f32.gmra.mrb[90].mxu1 %v704_v15 }
 0x114   :  { %2222 = vmatprep.mubr.msk.f32.mxu1 %vm2668_vm1, %v2667_v2  ;;  %v3264_v23 = vpop.f32.mrb[28].mxu1 }
 0x115   :  { %v705_v26 = vmax.f32 %v452_v19, 0.0  ;;  %v2096_v27 = vpop.f32.mrb[29].mxu1 }
 0x116   :  { %v456_v28 = vpop.f32.mrb[32].mxu0 }
 0x117   :  { %v457_v29 = vadd.f32 %v3154_v34, %v456_v28  ;;  %v2006_v30 = vpop.f32.mrb[33].mxu0  ;;  %2223 = vmatmul.mubr.f32.gmra.mrb[92].mxu1 %v705_v26 }
 0x118   :  { %2225 = vmatprep.mubr.msk.f32.mxu1 %vm2668_vm1, %v2667_v2  ;;  %v3270_v32 = vpop.f32.mrb[30].mxu1 }
 0x119   :  { %v706_v33 = vmax.f32 %v457_v29, 0.0  ;;  %v2099_v35 = vpop.f32.mrb[31].mxu1 }
 0x11a   :  { %v461_v36 = vpop.f32.mrb[34].mxu0 }
 0x11b   :  { %v462_v37 = vadd.f32 %v3154_v34, %v461_v36  ;;  %v2009_v39 = vpop.f32.mrb[35].mxu0  ;;  %2226 = vmatmul.mubr.f32.gmra.mrb[94].mxu1 %v706_v33 }
 0x11c   :  { %2228 = vmatprep.mubr.msk.f32.mxu1 %vm2668_vm1, %v2667_v2  ;;  %v3275_v40 = vpop.f32.mrb[32].mxu1 }
 0x11d   :  { %v707_v41 = vmax.f32 %v462_v37, 0.0  ;;  %v2102_v42 = vpop.f32.mrb[33].mxu1 }
 0x11e   :  { %v466_v4 = vpop.f32.mrb[36].mxu0 }
 0x11f   :  { %v467_v43 = vadd.f32 %v3154_v34, %v466_v4  ;;  %v2012_v46 = vpop.f32.mrb[37].mxu0  ;;  %2229 = vmatmul.mubr.f32.gmra.mrb[96].mxu1 %v707_v41 }
 0x120   :  { %2231 = vmatprep.mubr.msk.f32.mxu1 %vm2668_vm1, %v2667_v2  ;;  %v3280_v47 = vpop.f32.mrb[34].mxu1 }
 0x121   :  { %v708_v48 = vmax.f32 %v467_v43, 0.0  ;;  %v2105_v49 = vpop.f32.mrb[35].mxu1 }
 0x122   :  { %v471_v50 = vpop.f32.mrb[38].mxu0 }
 0x123   :  { %v472_v52 = vadd.f32 %v3154_v34, %v471_v50  ;;  %v2015_v53 = vpop.f32.mrb[39].mxu0  ;;  %2232 = vmatmul.mubr.f32.gmra.mrb[98].mxu1 %v708_v48 }
 0x124   :  { %2234 = vmatprep.mubr.msk.f32.mxu1 %vm2668_vm1, %v2667_v2  ;;  %v3291_v57 = vpop.f32.mrb[36].mxu1 }
 0x125   :  { %v709_v60 = vmax.f32 %v472_v52, 0.0  ;;  %v2108_v61 = vpop.f32.mrb[37].mxu1 }
 0x126   :  { %v476_v63 = vpop.f32.mrb[40].mxu0 }
 0x127   :  { %v477_v0 = vadd.f32 %v3154_v34, %v476_v63  ;;  %v2018_v1 = vpop.f32.mrb[41].mxu0  ;;  %2235 = vmatmul.mubr.f32.gmra.mrb[100].mxu1 %v709_v60 }
 0x128   :  { %2237 = vmatprep.mubr.msk.f32.mxu1 %vm2668_vm1, %v2667_v2  ;;  %v3296_v5 = vpop.f32.mrb[38].mxu1 }
 0x129   :  { %v710_v6 = vmax.f32 %v477_v0, 0.0  ;;  %v2111_v8 = vpop.f32.mrb[39].mxu1 }
 0x12a   :  { %v481_v9 = vpop.f32.mrb[42].mxu0 }
 0x12b   :  { %v482_v11 = vadd.f32 %v3154_v34, %v481_v9  ;;  %v2021_v12 = vpop.f32.mrb[43].mxu0  ;;  %2238 = vmatmul.mubr.f32.gmra.mrb[102].mxu1 %v710_v6 }
 0x12c   :  { %2240 = vmatprep.mubr.msk.f32.mxu1 %vm2668_vm1, %v2667_v2  ;;  %v3301_v13 = vpop.f32.mrb[40].mxu1 }
 0x12d   :  { %v711_v15 = vmax.f32 %v482_v11, 0.0  ;;  %v2114_v17 = vpop.f32.mrb[41].mxu1 }
 0x12e   :  { %v486_v18 = vpop.f32.mrb[44].mxu0 }
 0x12f   :  { %v487_v19 = vadd.f32 %v3154_v34, %v486_v18  ;;  %v2024_v20 = vpop.f32.mrb[45].mxu0  ;;  %2241 = vmatmul.mubr.f32.gmra.mrb[104].mxu1 %v711_v15 }
 0x130   :  { %2243 = vmatprep.mubr.msk.f32.mxu1 %vm2668_vm1, %v2667_v2  ;;  %v3306_v21 = vpop.f32.mrb[42].mxu1 }
 0x131   :  { %v712_v22 = vmax.f32 %v487_v19, 0.0  ;;  %v2117_v25 = vpop.f32.mrb[43].mxu1 }
 0x132   :  { %v491_v26 = vpop.f32.mrb[46].mxu0 }
 0x133   :  { %v492_v27 = vadd.f32 %v3154_v34, %v491_v26  ;;  %v2027_v28 = vpop.f32.mrb[47].mxu0  ;;  %2244 = vmatmul.mubr.f32.gmra.mrb[106].mxu1 %v712_v22 }
 0x134   :  { %2246 = vmatprep.mubr.msk.f32.mxu1 %vm2668_vm1, %v2667_v2  ;;  %v3311_v29 = vpop.f32.mrb[44].mxu1 }
 0x135   :  { %v713_v30 = vmax.f32 %v492_v27, 0.0  ;;  %v2120_v33 = vpop.f32.mrb[45].mxu1 }
 0x136   :  { %v496_v35 = vpop.f32.mrb[48].mxu0 }
 0x137   :  { %v497_v36 = vadd.f32 %v3154_v34, %v496_v35  ;;  %v2030_v37 = vpop.f32.mrb[49].mxu0  ;;  %2247 = vmatmul.mubr.f32.gmra.mrb[108].mxu1 %v713_v30 }
 0x138   :  { %2249 = vmatprep.mubr.msk.f32.mxu1 %vm2668_vm1, %v2667_v2  ;;  %v3316_v39 = vpop.f32.mrb[46].mxu1 }
 0x139   :  { %v714_v41 = vmax.f32 %v497_v36, 0.0  ;;  %v2123_v42 = vpop.f32.mrb[47].mxu1 }
 0x13a   :  { %v501_v4 = vpop.f32.mrb[50].mxu0 }
 0x13b   :  { %v502_v43 = vadd.f32 %v3154_v34, %v501_v4  ;;  %v2033_v46 = vpop.f32.mrb[51].mxu0  ;;  %2250 = vmatmul.mubr.f32.gmra.mrb[110].mxu1 %v714_v41 }
 0x13c   :  { %2252 = vmatprep.mubr.msk.f32.mxu1 %vm2668_vm1, %v2667_v2  ;;  %v3321_v48 = vpop.f32.mrb[48].mxu1  ;;  %v537_v46 = vadd.f32 %v3154_v34, %v3167_v45 }
 0x13d   :  { %v715_v49 = vmax.f32 %v502_v43, 0.0  ;;  %v2126_v50 = vpop.f32.mrb[49].mxu1 }
 0x13e   :  { %v506_v52 = vpop.f32.mrb[52].mxu0 }
 0x13f   :  { %v507_v53 = vadd.f32 %v3154_v34, %v506_v52  ;;  %v2036_v55 = vpop.f32.mrb[53].mxu0  ;;  %2253 = vmatmul.mubr.f32.gmra.mrb[112].mxu1 %v715_v49  ;;  %v722_v52 = vmax.f32 %v537_v46, 0.0 }
 0x140   :  { %2255 = vmatprep.mubr.msk.f32.mxu1 %vm2668_vm1, %v2667_v2  ;;  %v3326_v56 = vpop.f32.mrb[50].mxu1 }
 0x141   :  { %v716_v58 = vmax.f32 %v507_v53, 0.0  ;;  %v2129_v60 = vpop.f32.mrb[51].mxu1  ;;  %v542_v53 = vadd.f32 %v3154_v34, %v3172_v51 }
 0x142   :  { %v511_v61 = vpop.f32.mrb[54].mxu0  ;;  %v552_v60 = vadd.f32 %v3154_v34, %v3189_v3 }
 0x143   :  { %v512_v63 = vadd.f32 %v3154_v34, %v511_v61  ;;  %v2039_v0 = vpop.f32.mrb[55].mxu0  ;;  %2256 = vmatmul.mubr.f32.gmra.mrb[114].mxu1 %v716_v58  ;;  %v723_v55 = vmax.f32 %v542_v53, 0.0  ;;  %v547_v58 = vadd.f32 %v3154_v34, %v3183_v59  ;;  %v557_v61 = vadd.f32 %v3154_v34, %v3194_v10 }
 0x144   :  { %2258 = vmatprep.mubr.msk.f32.mxu1 %vm2668_vm1, %v2667_v2  ;;  %v3331_v1 = vpop.f32.mrb[52].mxu1  ;;  %v725_v51 = vmax.f32 %v552_v60, 0.0  ;;  %v567_v0 = vadd.f32 %v3154_v34, %v3210_v24  ;;  %v657_v53 = vadd.f32 %v3154_v34, %v3321_v48 }
 0x145   :  { %v717_v6 = vmax.f32 %v512_v63, 0.0  ;;  %v2132_v8 = vpop.f32.mrb[53].mxu1  ;;  %v724_v45 = vmax.f32 %v547_v58, 0.0  ;;  %v726_v59 = vmax.f32 %v557_v61, 0.0  ;;  %v562_v63 = vadd.f32 %v3154_v34, %v3199_v16 }
 0x146   :  { %v516_v9 = vpop.f32.mrb[56].mxu0  ;;  %v728_v10 = vmax.f32 %v567_v0, 0.0  ;;  %v577_v8 = vadd.f32 %v3154_v34, %v3221_v38  ;;  %v746_v60 = vmax.f32 %v657_v53, 0.0  ;;  %v667_v0 = vadd.f32 %v3154_v34, %v3331_v1 }
 0x147   :  { %v517_v11 = vadd.f32 %v3154_v34, %v516_v9  ;;  %v2042_v12 = vpop.f32.mrb[57].mxu0  ;;  %2259 = vmatmul.mubr.f32.gmra.mrb[116].mxu1 %v717_v6  ;;  %v727_v3 = vmax.f32 %v562_v63, 0.0  ;;  %v572_v6 = vadd.f32 %v3154_v34, %v3216_v31  ;;  %v582_v9 = vadd.f32 %v3154_v34, %v3226_v44 }
 0x148   :  { %2261 = vmatprep.mubr.msk.f32.mxu1 %vm2668_vm1, %v2667_v2  ;;  %v3336_v15 = vpop.f32.mrb[54].mxu1  ;;  %v730_v24 = vmax.f32 %v577_v8, 0.0  ;;  %v592_v12 = vadd.f32 %v3154_v34, %v3243_v62  ;;  %v748_v8 = vmax.f32 %v667_v0, 0.0 }
 0x149   :  { %v718_v17 = vmax.f32 %v517_v11, 0.0  ;;  %v2135_v18 = vpop.f32.mrb[55].mxu1  ;;  %v729_v16 = vmax.f32 %v572_v6, 0.0  ;;  %v731_v31 = vmax.f32 %v582_v9, 0.0  ;;  %v587_v11 = vadd.f32 %v3154_v34, %v3237_v54 }
 0x14a   :  { %v521_v19 = vpop.f32.mrb[58].mxu0  ;;  %v733_v44 = vmax.f32 %v592_v12, 0.0  ;;  %v602_v18 = vadd.f32 %v3154_v34, %v3253_v14 }
 0x14b   :  { %v522_v20 = vadd.f32 %v3154_v34, %v521_v19  ;;  %v2045_v22 = vpop.f32.mrb[59].mxu0  ;;  %2262 = vmatmul.mubr.f32.gmra.mrb[118].mxu1 %v718_v17  ;;  %v732_v38 = vmax.f32 %v587_v11, 0.0  ;;  %v597_v17 = vadd.f32 %v3154_v34, %v3248_v7  ;;  %v607_v19 = vadd.f32 %v3154_v34, %v3264_v23 }
 0x14c   :  { %2264 = vmatprep.mubr.msk.f32.mxu1 %vm2668_vm1, %v2667_v2  ;;  %v3341_v25 = vpop.f32.mrb[56].mxu1  ;;  %v735_v62 = vmax.f32 %v602_v18, 0.0  ;;  %v617_v22 = vadd.f32 %v3154_v34, %v3275_v40 }
 0x14d   :  { %v719_v26 = vmax.f32 %v522_v20, 0.0  ;;  %v2138_v27 = vpop.f32.mrb[57].mxu1  ;;  %v734_v54 = vmax.f32 %v597_v17, 0.0  ;;  %v736_v7 = vmax.f32 %v607_v19, 0.0  ;;  %v612_v20 = vadd.f32 %v3154_v34, %v3270_v32 }
 0x14e   :  { %v526_v28 = vpop.f32.mrb[60].mxu0  ;;  %v738_v23 = vmax.f32 %v617_v22, 0.0  ;;  %v627_v27 = vadd.f32 %v3154_v34, %v3291_v57  ;;  %v677_v12 = vadd.f32 %v3154_v34, %v3341_v25 }
 0x14f   :  { %v527_v30 = vadd.f32 %v3154_v34, %v526_v28  ;;  %v2048_v33 = vpop.f32.mrb[61].mxu0  ;;  %2265 = vmatmul.mubr.f32.gmra.mrb[120].mxu1 %v719_v26  ;;  %v737_v14 = vmax.f32 %v612_v20, 0.0  ;;  %v622_v26 = vadd.f32 %v3154_v34, %v3280_v47  ;;  %v632_v28 = vadd.f32 %v3154_v34, %v3296_v5  ;;  %v3442_v5 = vld [vmem:[%s3751_s2 + $0x1] ss:$0 sm:$0xff] }
 0x150   :  { %2267 = vmatprep.mubr.msk.f32.mxu1 %vm2668_vm1, %v2667_v2  ;;  %v3346_v35 = vpop.f32.mrb[58].mxu1  ;;  %v740_v40 = vmax.f32 %v627_v27, 0.0  ;;  %v642_v33 = vadd.f32 %v3154_v34, %v3306_v21  ;;  %v750_v18 = vmax.f32 %v677_v12, 0.0 }
 0x151   :  { %v720_v36 = vmax.f32 %v527_v30, 0.0  ;;  %v2141_v37 = vpop.f32.mrb[59].mxu1  ;;  %v739_v32 = vmax.f32 %v622_v26, 0.0  ;;  %v741_v47 = vmax.f32 %v632_v28, 0.0  ;;  %v637_v30 = vadd.f32 %v3154_v34, %v3301_v13 }
 0x152   :  { %v531_v41 = vpop.f32.mrb[62].mxu0  ;;  %v647_v13 = vadd.f32 %v3154_v34, %v3311_v29 }
 0x153   :  { %v532_v42 = vadd.f32 %v3154_v34, %v531_v41  ;;  %v2051_v4 = vpop.f32.mrb[63].mxu0  ;;  %2268 = vmatmul.mubr.f32.gmra.mrb[122].mxu1 %v720_v36  ;;  %v742_v57 = vmax.f32 %v637_v30, 0.0  ;;  %v743_v36 = vmax.f32 %v642_v33, 0.0 }
 0x154   :  { %2270 = vmatprep.mubr.msk.f32.mxu1 %vm2668_vm1, %v2667_v2  ;;  %v3351_v43 = vpop.f32.mrb[60].mxu1  ;;  %v744_v21 = vmax.f32 %v647_v13, 0.0  ;;  %v652_v4 = vadd.f32 %v3154_v34, %v3316_v39 }
 0x155   :  { %v721_v49 = vmax.f32 %v532_v42, 0.0  ;;  %v2144_v50 = vpop.f32.mrb[61].mxu1  ;;  %v687_v22 = vadd.f32 %v3154_v34, %v3351_v43 }
 0x156   :  { %v745_v29 = vmax.f32 %v652_v4, 0.0 }
 0x157   :  { %2271 = vmatmul.mubr.f32.gmra.mrb[124].mxu1 %v721_v49  ;;  %v752_v27 = vmax.f32 %v687_v22, 0.0 }
 0x158   :  { %2273 = vmatprep.mubr.msk.f32.mxu1 %vm2668_vm1, %v2667_v2 }
 0x15b   :  { %2274 = vmatmul.mubr.f32.gmra.mrb[126].mxu1 %v722_v52 }
 0x15c   :  { %2276 = vmatprep.mubr.msk.f32.mxu1 %vm2668_vm1, %v2667_v2 }
 0x15f   :  { %2277 = vmatmul.mubr.f32.gmra.mrb[128].mxu1 %v723_v55 }
 0x160   :  { %2279 = vmatprep.mubr.msk.f32.mxu1 %vm2668_vm1, %v2667_v2 }
 0x163   :  { %2280 = vmatmul.mubr.f32.gmra.mrb[130].mxu1 %v724_v45 }
 0x164   :  { %2282 = vmatprep.mubr.msk.f32.mxu1 %vm2668_vm1, %v2667_v2 }
 0x167   :  { %2283 = vmatmul.mubr.f32.gmra.mrb[132].mxu1 %v725_v51  ;;  %v662_v51 = vadd.f32 %v3154_v34, %v3326_v56 }
 0x168   :  { %2285 = vmatprep.mubr.msk.f32.mxu1 %vm2668_vm1, %v2667_v2 }
 0x16b   :  { %2286 = vmatmul.mubr.f32.gmra.mrb[134].mxu1 %v726_v59 }
 0x16c   :  { %2288 = vmatprep.mubr.msk.f32.mxu1 %vm2668_vm1, %v2667_v2 }
 0x16f   :  { %2289 = vmatmul.mubr.f32.gmra.mrb[136].mxu1 %v727_v3  ;;  %v747_v3 = vmax.f32 %v662_v51, 0.0 }
 0x170   :  { %2291 = vmatprep.mubr.msk.f32.mxu1 %vm2668_vm1, %v2667_v2 }
 0x173   :  { %2292 = vmatmul.mubr.f32.gmra.mrb[138].mxu1 %v728_v10 }
 0x174   :  { %2294 = vmatprep.mubr.msk.f32.mxu1 %vm2668_vm1, %v2667_v2 }
 0x177   :  { %2295 = vmatmul.mubr.f32.gmra.mrb[140].mxu1 %v729_v16 }
 0x178   :  { %2297 = vmatprep.mubr.msk.f32.mxu1 %vm2668_vm1, %v2667_v2 }
 0x17b   :  { %2298 = vmatmul.mubr.f32.gmra.mrb[142].mxu1 %v730_v24  ;;  %v672_v24 = vadd.f32 %v3154_v34, %v3336_v15 }
 0x17c   :  { %2300 = vmatprep.mubr.msk.f32.mxu1 %vm2668_vm1, %v2667_v2 }
 0x17f   :  { %2301 = vmatmul.mubr.f32.gmra.mrb[144].mxu1 %v731_v31 }
 0x180   :  { %2303 = vmatprep.mubr.msk.f32.mxu1 %vm2668_vm1, %v2667_v2 }
 0x183   :  { %2304 = vmatmul.mubr.f32.gmra.mrb[146].mxu1 %v732_v38  ;;  %v749_v38 = vmax.f32 %v672_v24, 0.0 }
 0x184   :  { %2306 = vmatprep.mubr.msk.f32.mxu1 %vm2668_vm1, %v2667_v2 }
 0x187   :  { %2307 = vmatmul.mubr.f32.gmra.mrb[148].mxu1 %v733_v44 }
 0x188   :  { %2309 = vmatprep.mubr.msk.f32.mxu1 %vm2668_vm1, %v2667_v2 }
 0x18b   :  { %2310 = vmatmul.mubr.f32.gmra.mrb[150].mxu1 %v734_v54 }
 0x18c   :  { %2312 = vmatprep.mubr.msk.f32.mxu1 %vm2668_vm1, %v2667_v2 }
 0x18f   :  { %2313 = vmatmul.mubr.f32.gmra.mrb[152].mxu1 %v735_v62  ;;  %v682_v62 = vadd.f32 %v3154_v34, %v3346_v35 }
 0x190   :  { %2315 = vmatprep.mubr.msk.f32.mxu1 %vm2668_vm1, %v2667_v2 }
 0x193   :  { %2316 = vmatmul.mubr.f32.gmra.mrb[154].mxu1 %v736_v7 }
 0x194   :  { %2318 = vmatprep.mubr.msk.f32.mxu1 %vm2668_vm1, %v2667_v2 }
 0x197   :  { %2319 = vmatmul.mubr.f32.gmra.mrb[156].mxu1 %v737_v14  ;;  %v751_v14 = vmax.f32 %v682_v62, 0.0 }
 0x198   :  { %2321 = vmatprep.mubr.msk.f32.mxu1 %vm2668_vm1, %v2667_v2 }
 0x19b   :  { %2322 = vmatmul.mubr.f32.gmra.mrb[158].mxu1 %v738_v23 }
 0x19c   :  { %2324 = vmatprep.mubr.msk.f32.mxu1 %vm2668_vm1, %v2667_v2 }
 0x19f   :  { %2325 = vmatmul.mubr.f32.gmra.mrb[160].mxu1 %v739_v32 }
 0x1a0   :  { %2327 = vmatprep.mubr.msk.f32.mxu1 %vm2668_vm1, %v2667_v2 }
 0x1a3   :  { %2328 = vmatmul.mubr.f32.gmra.mrb[162].mxu1 %v740_v40 }
 0x1a4   :  { %2330 = vmatprep.mubr.msk.f32.mxu1 %vm2668_vm1, %v2667_v2 }
 0x1a7   :  { %2331 = vmatmul.mubr.f32.gmra.mrb[164].mxu1 %v741_v47 }
 0x1a8   :  { %2333 = vmatprep.mubr.msk.f32.mxu1 %vm2668_vm1, %v2667_v2 }
 0x1ab   :  { %2334 = vmatmul.mubr.f32.gmra.mrb[166].mxu1 %v742_v57 }
 0x1ac   :  { %2336 = vmatprep.mubr.msk.f32.mxu1 %vm2668_vm1, %v2667_v2 }
 0x1ae   :  { %v824_v37 = vpop.f32.mrb[62].mxu1 }
 0x1af   :  { %v825_v41 = vadd.f32 %v3442_v5, %v824_v37  ;;  %v2179_v42 = vpop.f32.mrb[63].mxu1  ;;  %2337 = vmatmul.mubr.f32.gmra.mrb[168].mxu1 %v743_v36 }
 0x1b0   :  { %2339 = vmatprep.mubr.msk.f32.mxu1 %vm2668_vm1, %v2667_v2 }
 0x1b1   :  { %v1138_v46 = vmax.f32 %v825_v41, 0.0 }
 0x1b2   :  { %v829_v49 = vpop.f32.mrb[64].mxu1 }
 0x1b3   :  { %v830_v50 = vadd.f32 %v3442_v5, %v829_v49  ;;  %v2182_v52 = vpop.f32.mrb[65].mxu1  ;;  %2340 = vmatmul.mubr.f32.gmra.mrb[170].mxu1 %v744_v21  ;;  %2399 = vmatmul.mubr.f32.vlgmr.msra.gmra.mrb[64].mxu0 %v1138_v46 }
 0x1b4   :  { %2342 = vmatprep.mubr.msk.f32.mxu1 %vm2668_vm1, %v2667_v2  ;;  %2401 = vmatprep.mubr.msk.f32.mxu0 %vm2668_vm1, %v2667_v2 }
 0x1b5   :  { %v1139_v55 = vmax.f32 %v830_v50, 0.0 }
 0x1b6   :  { %v834_v58 = vpop.f32.mrb[66].mxu1 }
 0x1b7   :  { %v835_v39 = vadd.f32 %v3442_v5, %v834_v58  ;;  %v2185_v45 = vpop.f32.mrb[67].mxu1  ;;  %2343 = vmatmul.mubr.f32.gmra.mrb[172].mxu1 %v745_v29  ;;  %2402 = vmatmul.mubr.f32.gmra.mrb[66].mxu0 %v1139_v55 }
 0x1b8   :  { %2345 = vmatprep.mubr.msk.f32.mxu1 %vm2668_vm1, %v2667_v2  ;;  %2404 = vmatprep.mubr.msk.f32.mxu0 %vm2668_vm1, %v2667_v2 }
 0x1b9   :  { %v1140_v61 = vmax.f32 %v835_v39, 0.0 }
 0x1ba   :  { %v839_v59 = vpop.f32.mrb[68].mxu1 }
 0x1bb   :  { %v840_v48 = vadd.f32 %v3442_v5, %v839_v59  ;;  %v2188_v63 = vpop.f32.mrb[69].mxu1  ;;  %2346 = vmatmul.mubr.f32.gmra.mrb[174].mxu1 %v746_v60  ;;  %2405 = vmatmul.mubr.f32.gmra.mrb[68].mxu0 %v1140_v61 }
 0x1bc   :  { %2348 = vmatprep.mubr.msk.f32.mxu1 %vm2668_vm1, %v2667_v2  ;;  %2407 = vmatprep.mubr.msk.f32.mxu0 %vm2668_vm1, %v2667_v2 }
 0x1bd   :  { %v1141_v10 = vmax.f32 %v840_v48, 0.0 }
 0x1be   :  { %v844_v6 = vpop.f32.mrb[70].mxu1 }
 0x1bf   :  { %v845_v56 = vadd.f32 %v3442_v5, %v844_v6  ;;  %v2191_v16 = vpop.f32.mrb[71].mxu1  ;;  %2349 = vmatmul.mubr.f32.gmra.mrb[176].mxu1 %v747_v3  ;;  %2408 = vmatmul.mubr.f32.gmra.mrb[70].mxu0 %v1141_v10 }
 0x1c0   :  { %2351 = vmatprep.mubr.msk.f32.mxu1 %vm2668_vm1, %v2667_v2  ;;  %2410 = vmatprep.mubr.msk.f32.mxu0 %vm2668_vm1, %v2667_v2 }
 0x1c1   :  { %v1142_v9 = vmax.f32 %v845_v56, 0.0 }
 0x1c2   :  { %v849_v31 = vpop.f32.mrb[72].mxu1 }
 0x1c3   :  { %v850_v1 = vadd.f32 %v3442_v5, %v849_v31  ;;  %v2194_v11 = vpop.f32.mrb[73].mxu1  ;;  %2352 = vmatmul.mubr.f32.gmra.mrb[178].mxu1 %v748_v8  ;;  %2411 = vmatmul.mubr.f32.gmra.mrb[72].mxu0 %v1142_v9 }
 0x1c4   :  { %2354 = vmatprep.mubr.msk.f32.mxu1 %vm2668_vm1, %v2667_v2  ;;  %2413 = vmatprep.mubr.msk.f32.mxu0 %vm2668_vm1, %v2667_v2 }
 0x1c5   :  { %v1143_v44 = vmax.f32 %v850_v1, 0.0 }
 0x1c6   :  { %v854_v17 = vpop.f32.mrb[74].mxu1 }
 0x1c7   :  { %v855_v15 = vadd.f32 %v3442_v5, %v854_v17  ;;  %v2197_v54 = vpop.f32.mrb[75].mxu1  ;;  %2355 = vmatmul.mubr.f32.gmra.mrb[180].mxu1 %v749_v38  ;;  %2414 = vmatmul.mubr.f32.gmra.mrb[74].mxu0 %v1143_v44 }
 0x1c8   :  { %2357 = vmatprep.mubr.msk.f32.mxu1 %vm2668_vm1, %v2667_v2  ;;  %2416 = vmatprep.mubr.msk.f32.mxu0 %vm2668_vm1, %v2667_v2 }
 0x1c9   :  { %v1144_v19 = vmax.f32 %v855_v15, 0.0 }
 0x1ca   :  { %v859_v7 = vpop.f32.mrb[76].mxu1 }
 0x1cb   :  { %v860_v25 = vadd.f32 %v3442_v5, %v859_v7  ;;  %v2200_v20 = vpop.f32.mrb[77].mxu1  ;;  %2358 = vmatmul.mubr.f32.gmra.mrb[182].mxu1 %v750_v18  ;;  %2417 = vmatmul.mubr.f32.gmra.mrb[76].mxu0 %v1144_v19 }
 0x1cc   :  { %2360 = vmatprep.mubr.msk.f32.mxu1 %vm2668_vm1, %v2667_v2  ;;  %2419 = vmatprep.mubr.msk.f32.mxu0 %vm2668_vm1, %v2667_v2 }
 0x1cd   :  { %v1145_v23 = vmax.f32 %v860_v25, 0.0 }
 0x1ce   :  { %v864_v26 = vpop.f32.mrb[78].mxu1 }
 0x1cf   :  { %v865_v35 = vadd.f32 %v3442_v5, %v864_v26  ;;  %v2203_v32 = vpop.f32.mrb[79].mxu1  ;;  %2361 = vmatmul.mubr.f32.gmra.mrb[184].mxu1 %v751_v14  ;;  %2420 = vmatmul.mubr.f32.gmra.mrb[78].mxu0 %v1145_v23 }
 0x1d0   :  { %2363 = vmatprep.mubr.msk.f32.mxu1 %vm2668_vm1, %v2667_v2  ;;  %2422 = vmatprep.mubr.msk.f32.mxu0 %vm2668_vm1, %v2667_v2 }
 0x1d1   :  { %v1146_v40 = vmax.f32 %v865_v35, 0.0 }
 0x1d2   :  { %v869_v28 = vpop.f32.mrb[80].mxu1 }
 0x1d3   :  { %v870_v47 = vadd.f32 %v3442_v5, %v869_v28  ;;  %v2206_v30 = vpop.f32.mrb[81].mxu1  ;;  %2364 = vmatmul.mubr.f32.gmra.mrb[186].mxu1 %v752_v27  ;;  %2423 = vmatmul.mubr.f32.gmra.mrb[80].mxu0 %v1146_v40 }
 0x1d4   :  { %2425 = vmatprep.mubr.msk.f32.mxu0 %vm2668_vm1, %v2667_v2 }
 0x1d5   :  { %v1147_v34 = vmax.f32 %v870_v47, 0.0 }
 0x1d6   :  { %v874_v43 = vpop.f32.mrb[82].mxu1 }
 0x1d7   :  { %v875_v57 = vadd.f32 %v3442_v5, %v874_v43  ;;  %v2209_v33 = vpop.f32.mrb[83].mxu1  ;;  %2426 = vmatmul.mubr.f32.gmra.mrb[82].mxu0 %v1147_v34 }
 0x1d8   :  { %2428 = vmatprep.mubr.msk.f32.mxu0 %vm2668_vm1, %v2667_v2 }
 0x1d9   :  { %v1148_v36 = vmax.f32 %v875_v57, 0.0 }
 0x1da   :  { %v879_v13 = vpop.f32.mrb[84].mxu1 }
 0x1db   :  { %v880_v37 = vadd.f32 %v3442_v5, %v879_v13  ;;  %v2212_v41 = vpop.f32.mrb[85].mxu1  ;;  %2429 = vmatmul.mubr.f32.gmra.mrb[84].mxu0 %v1148_v36 }
 0x1dc   :  { %2431 = vmatprep.mubr.msk.f32.mxu0 %vm2668_vm1, %v2667_v2 }
 0x1dd   :  { %v1149_v42 = vmax.f32 %v880_v37, 0.0 }
 0x1de   :  { %v884_v21 = vpop.f32.mrb[86].mxu1 }
 0x1df   :  { %v885_v4 = vadd.f32 %v3442_v5, %v884_v21  ;;  %v2215_v46 = vpop.f32.mrb[87].mxu1  ;;  %2432 = vmatmul.mubr.f32.gmra.mrb[86].mxu0 %v1149_v42 }
 0x1e0   :  { %2434 = vmatprep.mubr.msk.f32.mxu0 %vm2668_vm1, %v2667_v2 }
 0x1e1   :  { %v1150_v49 = vmax.f32 %v885_v4, 0.0 }
 0x1e2   :  { %v889_v50 = vpop.f32.mrb[88].mxu1 }
 0x1e3   :  { %v890_v52 = vadd.f32 %v3442_v5, %v889_v50  ;;  %v2218_v29 = vpop.f32.mrb[89].mxu1  ;;  %2435 = vmatmul.mubr.f32.gmra.mrb[88].mxu0 %v1150_v49 }
 0x1e4   :  { %2437 = vmatprep.mubr.msk.f32.mxu0 %vm2668_vm1, %v2667_v2 }
 0x1e5   :  { %v1151_v53 = vmax.f32 %v890_v52, 0.0 }
 0x1e6   :  { %v894_v55 = vpop.f32.mrb[90].mxu1 }
 0x1e7   :  { %v895_v58 = vadd.f32 %v3442_v5, %v894_v55  ;;  %v2221_v39 = vpop.f32.mrb[91].mxu1  ;;  %2438 = vmatmul.mubr.f32.gmra.mrb[90].mxu0 %v1151_v53 }
 0x1e8   :  { %2440 = vmatprep.mubr.msk.f32.mxu0 %vm2668_vm1, %v2667_v2 }
 0x1e9   :  { %v1152_v45 = vmax.f32 %v895_v58, 0.0 }
 0x1ea   :  { %v899_v60 = vpop.f32.mrb[92].mxu1 }
 0x1eb   :  { %v900_v51 = vadd.f32 %v3442_v5, %v899_v60  ;;  %v2224_v61 = vpop.f32.mrb[93].mxu1  ;;  %2441 = vmatmul.mubr.f32.gmra.mrb[92].mxu0 %v1152_v45 }
 0x1ec   :  { %2443 = vmatprep.mubr.msk.f32.mxu0 %vm2668_vm1, %v2667_v2 }
 0x1ed   :  { %v1153_v59 = vmax.f32 %v900_v51, 0.0 }
 0x1ee   :  { %v904_v48 = vpop.f32.mrb[94].mxu1 }
 0x1ef   :  { %v905_v63 = vadd.f32 %v3442_v5, %v904_v48  ;;  %v2227_v3 = vpop.f32.mrb[95].mxu1  ;;  %2444 = vmatmul.mubr.f32.gmra.mrb[94].mxu0 %v1153_v59 }
 0x1f0   :  { %2446 = vmatprep.mubr.msk.f32.mxu0 %vm2668_vm1, %v2667_v2 }
 0x1f1   :  { %v1154_v0 = vmax.f32 %v905_v63, 0.0 }
 0x1f2   :  { %v909_v10 = vpop.f32.mrb[96].mxu1 }
 0x1f3   :  { %v910_v6 = vadd.f32 %v3442_v5, %v909_v10  ;;  %v2230_v56 = vpop.f32.mrb[97].mxu1  ;;  %2447 = vmatmul.mubr.f32.gmra.mrb[96].mxu0 %v1154_v0 }
 0x1f4   :  { %2449 = vmatprep.mubr.msk.f32.mxu0 %vm2668_vm1, %v2667_v2 }
 0x1f5   :  { %v1155_v16 = vmax.f32 %v910_v6, 0.0 }
 0x1f6   :  { %v914_v8 = vpop.f32.mrb[98].mxu1 }
 0x1f7   :  { %v915_v24 = vadd.f32 %v3442_v5, %v914_v8  ;;  %v2233_v9 = vpop.f32.mrb[99].mxu1  ;;  %2450 = vmatmul.mubr.f32.gmra.mrb[98].mxu0 %v1155_v16 }
 0x1f8   :  { %2452 = vmatprep.mubr.msk.f32.mxu0 %vm2668_vm1, %v2667_v2 }
 0x1f9   :  { %v1156_v31 = vmax.f32 %v915_v24, 0.0 }
 0x1fa   :  { %v919_v1 = vpop.f32.mrb[100].mxu1 }
 0x1fb   :  { %v920_v11 = vadd.f32 %v3442_v5, %v919_v1  ;;  %v2236_v38 = vpop.f32.mrb[101].mxu1  ;;  %2453 = vmatmul.mubr.f32.gmra.mrb[100].mxu0 %v1156_v31 }
 0x1fc   :  { %2455 = vmatprep.mubr.msk.f32.mxu0 %vm2668_vm1, %v2667_v2 }
 0x1fd   :  { %v1157_v12 = vmax.f32 %v920_v11, 0.0 }
 0x1fe   :  { %v924_v44 = vpop.f32.mrb[102].mxu1 }
 0x1ff   :  { %v925_v17 = vadd.f32 %v3442_v5, %v924_v44  ;;  %v2239_v15 = vpop.f32.mrb[103].mxu1  ;;  %2456 = vmatmul.mubr.f32.gmra.mrb[102].mxu0 %v1157_v12 }
 0x200   :  { %2458 = vmatprep.mubr.msk.f32.mxu0 %vm2668_vm1, %v2667_v2 }
 0x201   :  { %v1158_v54 = vmax.f32 %v925_v17, 0.0 }
 0x202   :  { %v929_v18 = vpop.f32.mrb[104].mxu1 }
 0x203   :  { %v930_v62 = vadd.f32 %v3442_v5, %v929_v18  ;;  %v2242_v19 = vpop.f32.mrb[105].mxu1  ;;  %2459 = vmatmul.mubr.f32.gmra.mrb[104].mxu0 %v1158_v54 }
 0x204   :  { %2461 = vmatprep.mubr.msk.f32.mxu0 %vm2668_vm1, %v2667_v2 }
 0x205   :  { %v1159_v7 = vmax.f32 %v930_v62, 0.0 }
 0x206   :  { %v934_v25 = vpop.f32.mrb[106].mxu1 }
 0x207   :  { %v935_v20 = vadd.f32 %v3442_v5, %v934_v25  ;;  %v2245_v14 = vpop.f32.mrb[107].mxu1  ;;  %2462 = vmatmul.mubr.f32.gmra.mrb[106].mxu0 %v1159_v7 }
 0x208   :  { %2464 = vmatprep.mubr.msk.f32.mxu0 %vm2668_vm1, %v2667_v2 }
 0x209   :  { %v1160_v22 = vmax.f32 %v935_v20, 0.0 }
 0x20a   :  { %v939_v23 = vpop.f32.mrb[108].mxu1 }
 0x20b   :  { %v940_v26 = vadd.f32 %v3442_v5, %v939_v23  ;;  %v2248_v35 = vpop.f32.mrb[109].mxu1  ;;  %2465 = vmatmul.mubr.f32.gmra.mrb[108].mxu0 %v1160_v22 }
 0x20c   :  { %2467 = vmatprep.mubr.msk.f32.mxu0 %vm2668_vm1, %v2667_v2 }
 0x20d   :  { %v1161_v32 = vmax.f32 %v940_v26, 0.0 }
 0x20e   :  { %v944_v27 = vpop.f32.mrb[110].mxu1 }
 0x20f   :  { %v945_v40 = vadd.f32 %v3442_v5, %v944_v27  ;;  %v2251_v28 = vpop.f32.mrb[111].mxu1  ;;  %2468 = vmatmul.mubr.f32.gmra.mrb[110].mxu0 %v1161_v32 }
 0x210   :  { %2470 = vmatprep.mubr.msk.f32.mxu0 %vm2668_vm1, %v2667_v2 }
 0x211   :  { %v1162_v47 = vmax.f32 %v945_v40, 0.0 }
 0x212   :  { %v949_v30 = vpop.f32.mrb[112].mxu1 }
 0x213   :  { %v950_v34 = vadd.f32 %v3442_v5, %v949_v30  ;;  %v2254_v43 = vpop.f32.mrb[113].mxu1  ;;  %2471 = vmatmul.mubr.f32.gmra.mrb[112].mxu0 %v1162_v47 }
 0x214   :  { %2473 = vmatprep.mubr.msk.f32.mxu0 %vm2668_vm1, %v2667_v2 }
 0x215   :  { %v1163_v57 = vmax.f32 %v950_v34, 0.0 }
 0x216   :  { %v954_v33 = vpop.f32.mrb[114].mxu1 }
 0x217   :  { %v955_v36 = vadd.f32 %v3442_v5, %v954_v33  ;;  %v2257_v13 = vpop.f32.mrb[115].mxu1  ;;  %2474 = vmatmul.mubr.f32.gmra.mrb[114].mxu0 %v1163_v57 }
 0x218   :  { %2476 = vmatprep.mubr.msk.f32.mxu0 %vm2668_vm1, %v2667_v2 }
 0x219   :  { %v1164_v37 = vmax.f32 %v955_v36, 0.0 }
 0x21a   :  { %v959_v41 = vpop.f32.mrb[116].mxu1 }
 0x21b   :  { %v960_v42 = vadd.f32 %v3442_v5, %v959_v41  ;;  %v2260_v21 = vpop.f32.mrb[117].mxu1  ;;  %2477 = vmatmul.mubr.f32.gmra.mrb[116].mxu0 %v1164_v37 }
 0x21c   :  { %2479 = vmatprep.mubr.msk.f32.mxu0 %vm2668_vm1, %v2667_v2 }
 0x21d   :  { %v1165_v4 = vmax.f32 %v960_v42, 0.0 }
 0x21e   :  { %v964_v46 = vpop.f32.mrb[118].mxu1 }
 0x21f   :  { %v965_v49 = vadd.f32 %v3442_v5, %v964_v46  ;;  %v2263_v50 = vpop.f32.mrb[119].mxu1  ;;  %2480 = vmatmul.mubr.f32.gmra.mrb[118].mxu0 %v1165_v4 }
 0x220   :  { %2482 = vmatprep.mubr.msk.f32.mxu0 %vm2668_vm1, %v2667_v2 }
 0x221   :  { %v1166_v52 = vmax.f32 %v965_v49, 0.0 }
 0x222   :  { %v969_v29 = vpop.f32.mrb[120].mxu1 }
 0x223   :  { %v970_v53 = vadd.f32 %v3442_v5, %v969_v29  ;;  %v2266_v55 = vpop.f32.mrb[121].mxu1  ;;  %2483 = vmatmul.mubr.f32.gmra.mrb[120].mxu0 %v1166_v52 }
 0x224   :  { %2485 = vmatprep.mubr.msk.f32.mxu0 %vm2668_vm1, %v2667_v2 }
 0x225   :  { %v1167_v58 = vmax.f32 %v970_v53, 0.0 }
 0x226   :  { %v974_v39 = vpop.f32.mrb[122].mxu1 }
 0x227   :  { %v975_v45 = vadd.f32 %v3442_v5, %v974_v39  ;;  %v2269_v60 = vpop.f32.mrb[123].mxu1  ;;  %2486 = vmatmul.mubr.f32.gmra.mrb[122].mxu0 %v1167_v58 }
 0x228   :  { %2488 = vmatprep.mubr.msk.f32.mxu0 %vm2668_vm1, %v2667_v2 }
 0x229   :  { %v1168_v51 = vmax.f32 %v975_v45, 0.0 }
 0x22a   :  { %v979_v61 = vpop.f32.mrb[124].mxu1 }
 0x22b   :  { %v980_v59 = vadd.f32 %v3442_v5, %v979_v61  ;;  %v2272_v48 = vpop.f32.mrb[125].mxu1  ;;  %2489 = vmatmul.mubr.f32.gmra.mrb[124].mxu0 %v1168_v51 }
 0x22c   :  { %2491 = vmatprep.mubr.msk.f32.mxu0 %vm2668_vm1, %v2667_v2 }
 0x22d   :  { %v1169_v63 = vmax.f32 %v980_v59, 0.0 }
 0x22e   :  { %v984_v3 = vpop.f32.mrb[126].mxu1 }
 0x22f   :  { %v985_v0 = vadd.f32 %v3442_v5, %v984_v3  ;;  %v2275_v10 = vpop.f32.mrb[127].mxu1  ;;  %2492 = vmatmul.mubr.f32.gmra.mrb[126].mxu0 %v1169_v63 }
 0x230   :  { %2494 = vmatprep.mubr.msk.f32.mxu0 %vm2668_vm1, %v2667_v2 }
 0x231   :  { %v1170_v6 = vmax.f32 %v985_v0, 0.0 }
 0x232   :  { %v989_v56 = vpop.f32.mrb[128].mxu1 }
 0x233   :  { %v990_v16 = vadd.f32 %v3442_v5, %v989_v56  ;;  %v2278_v8 = vpop.f32.mrb[129].mxu1  ;;  %2495 = vmatmul.mubr.f32.gmra.mrb[128].mxu0 %v1170_v6 }
 0x234   :  { %2497 = vmatprep.mubr.msk.f32.mxu0 %vm2668_vm1, %v2667_v2 }
 0x235   :  { %v1171_v24 = vmax.f32 %v990_v16, 0.0 }
 0x236   :  { %v994_v9 = vpop.f32.mrb[130].mxu1 }
 0x237   :  { %v995_v31 = vadd.f32 %v3442_v5, %v994_v9  ;;  %v2281_v1 = vpop.f32.mrb[131].mxu1  ;;  %2498 = vmatmul.mubr.f32.gmra.mrb[130].mxu0 %v1171_v24 }
 0x238   :  { %2500 = vmatprep.mubr.msk.f32.mxu0 %vm2668_vm1, %v2667_v2 }
 0x239   :  { %v1172_v11 = vmax.f32 %v995_v31, 0.0 }
 0x23a   :  { %v999_v38 = vpop.f32.mrb[132].mxu1 }
 0x23b   :  { %v1000_v12 = vadd.f32 %v3442_v5, %v999_v38  ;;  %v2284_v44 = vpop.f32.mrb[133].mxu1  ;;  %2501 = vmatmul.mubr.f32.gmra.mrb[132].mxu0 %v1172_v11 }
 0x23c   :  { %2503 = vmatprep.mubr.msk.f32.mxu0 %vm2668_vm1, %v2667_v2 }
 0x23d   :  { %v1173_v17 = vmax.f32 %v1000_v12, 0.0 }
 0x23e   :  { %v1004_v15 = vpop.f32.mrb[134].mxu1 }
 0x23f   :  { %v1005_v54 = vadd.f32 %v3442_v5, %v1004_v15  ;;  %v2287_v18 = vpop.f32.mrb[135].mxu1  ;;  %2504 = vmatmul.mubr.f32.gmra.mrb[134].mxu0 %v1173_v17 }
 0x240   :  { %2506 = vmatprep.mubr.msk.f32.mxu0 %vm2668_vm1, %v2667_v2 }
 0x241   :  { %v1174_v62 = vmax.f32 %v1005_v54, 0.0 }
 0x242   :  { %v1009_v19 = vpop.f32.mrb[136].mxu1 }
 0x243   :  { %v1010_v7 = vadd.f32 %v3442_v5, %v1009_v19  ;;  %v2290_v25 = vpop.f32.mrb[137].mxu1  ;;  %2507 = vmatmul.mubr.f32.gmra.mrb[136].mxu0 %v1174_v62 }
 0x244   :  { %2509 = vmatprep.mubr.msk.f32.mxu0 %vm2668_vm1, %v2667_v2 }
 0x245   :  { %v1175_v20 = vmax.f32 %v1010_v7, 0.0 }
 0x246   :  { %v1014_v14 = vpop.f32.mrb[138].mxu1 }
 0x247   :  { %v1015_v22 = vadd.f32 %v3442_v5, %v1014_v14  ;;  %v2293_v23 = vpop.f32.mrb[139].mxu1  ;;  %2510 = vmatmul.mubr.f32.gmra.mrb[138].mxu0 %v1175_v20 }
 0x248   :  { %2512 = vmatprep.mubr.msk.f32.mxu0 %vm2668_vm1, %v2667_v2 }
 0x249   :  { %v1176_v26 = vmax.f32 %v1015_v22, 0.0  ;;  %v3643_v22 = vld [vmem:[%s3751_s2 + $0x2] ss:$0 sm:$0xff]  ;;  %s2670_s2 = smov [#allocation2]  }
 0x24a   :  { %v1019_v35 = vpop.f32.mrb[140].mxu1  ;;  %s1654_s18 = sshll.u32 %s2670_s2, 4  ;;  %s1655_s18 = int_to_ptr.vmem [resolvable:$true] %s1654_s18 }
 0x24b   :  { %v1020_v32 = vadd.f32 %v3442_v5, %v1019_v35  ;;  %v2296_v27 = vpop.f32.mrb[141].mxu1  ;;  %2513 = vmatmul.mubr.f32.gmra.mrb[140].mxu0 %v1176_v26  ;;  %s2643_s19 = scalar_lea.vmem %s1655_s18, 8064  ;;  %p2648_p1 = scmp.lt.s32.totalorder %s1655_s18, %s1655_s18 }
 0x24c   :  { %2515 = vmatprep.mubr.msk.f32.mxu0 %vm2668_vm1, %v2667_v2  ;;  %p2644_p0 = scmp.ne.s32.totalorder %s1655_s18, %s2643_s19  ;;  %p2649_p2 = scmp.lt.s32.totalorder %s2643_s19, %s2643_s19 }
 0x24d   :  { %v1177_v40 = vmax.f32 %v1020_v32, 0.0 }
 0x24e   :  { %v1024_v28 = vpop.f32.mrb[142].mxu1  ;;  %p2650_p3 = por %p2649_p2, %p2648_p1 }
 0x24f   :  { %v1025_v47 = vadd.f32 %v3442_v5, %v1024_v28  ;;  %v2299_v30 = vpop.f32.mrb[143].mxu1  ;;  %2516 = vmatmul.mubr.f32.gmra.mrb[142].mxu0 %v1177_v40 }
 0x250   :  { %2518 = vmatprep.mubr.msk.f32.mxu0 %vm2668_vm1, %v2667_v2  ;;  %p2651_p4 = pnand %p2650_p3, %p2644_p0 }
 0x251   :  { %v1178_v34 = vmax.f32 %v1025_v47, 0.0 }
 0x252   :  { %v1029_v43 = vpop.f32.mrb[144].mxu1 }
 0x253   :  { %v1030_v57 = vadd.f32 %v3442_v5, %v1029_v43  ;;  %v2302_v33 = vpop.f32.mrb[145].mxu1  ;;  %2519 = vmatmul.mubr.f32.gmra.mrb[144].mxu0 %v1178_v34 }
 0x254   :  { %2521 = vmatprep.mubr.msk.f32.mxu0 %vm2668_vm1, %v2667_v2 }
 0x255   :  { %v1179_v36 = vmax.f32 %v1030_v57, 0.0 }
 0x256   :  { %v1034_v13 = vpop.f32.mrb[146].mxu1 }
 0x257   :  { %v1035_v37 = vadd.f32 %v3442_v5, %v1034_v13  ;;  %v2305_v41 = vpop.f32.mrb[147].mxu1  ;;  %2522 = vmatmul.mubr.f32.gmra.mrb[146].mxu0 %v1179_v36 }
 0x258   :  { %2524 = vmatprep.mubr.msk.f32.mxu0 %vm2668_vm1, %v2667_v2 }
 0x259   :  { %v1180_v42 = vmax.f32 %v1035_v37, 0.0 }
 0x25a   :  { %v1039_v21 = vpop.f32.mrb[148].mxu1 }
 0x25b   :  { %v1040_v4 = vadd.f32 %v3442_v5, %v1039_v21  ;;  %v2308_v46 = vpop.f32.mrb[149].mxu1  ;;  %2525 = vmatmul.mubr.f32.gmra.mrb[148].mxu0 %v1180_v42 }
 0x25c   :  { %2527 = vmatprep.mubr.msk.f32.mxu0 %vm2668_vm1, %v2667_v2 }
 0x25d   :  { %v1181_v49 = vmax.f32 %v1040_v4, 0.0 }
 0x25e   :  { %v1044_v50 = vpop.f32.mrb[150].mxu1 }
 0x25f   :  { %v1045_v52 = vadd.f32 %v3442_v5, %v1044_v50  ;;  %v2311_v29 = vpop.f32.mrb[151].mxu1  ;;  %2528 = vmatmul.mubr.f32.gmra.mrb[150].mxu0 %v1181_v49 }
 0x260   :  { %2530 = vmatprep.mubr.msk.f32.mxu0 %vm2668_vm1, %v2667_v2 }
 0x261   :  { %v1182_v53 = vmax.f32 %v1045_v52, 0.0 }
 0x262   :  { %v1049_v55 = vpop.f32.mrb[152].mxu1 }
 0x263   :  { %v1050_v58 = vadd.f32 %v3442_v5, %v1049_v55  ;;  %v2314_v39 = vpop.f32.mrb[153].mxu1  ;;  %2531 = vmatmul.mubr.f32.gmra.mrb[152].mxu0 %v1182_v53 }
 0x264   :  { %2533 = vmatprep.mubr.msk.f32.mxu0 %vm2668_vm1, %v2667_v2 }
 0x265   :  { %v1183_v45 = vmax.f32 %v1050_v58, 0.0 }
 0x266   :  { %v1054_v60 = vpop.f32.mrb[154].mxu1 }
 0x267   :  { %v1055_v51 = vadd.f32 %v3442_v5, %v1054_v60  ;;  %v2317_v61 = vpop.f32.mrb[155].mxu1  ;;  %2534 = vmatmul.mubr.f32.gmra.mrb[154].mxu0 %v1183_v45 }
 0x268   :  { %2536 = vmatprep.mubr.msk.f32.mxu0 %vm2668_vm1, %v2667_v2 }
 0x269   :  { %v1184_v59 = vmax.f32 %v1055_v51, 0.0 }
 0x26a   :  { %v1059_v48 = vpop.f32.mrb[156].mxu1 }
 0x26b   :  { %v1060_v63 = vadd.f32 %v3442_v5, %v1059_v48  ;;  %v2320_v3 = vpop.f32.mrb[157].mxu1  ;;  %2537 = vmatmul.mubr.f32.gmra.mrb[156].mxu0 %v1184_v59 }
 0x26c   :  { %2539 = vmatprep.mubr.msk.f32.mxu0 %vm2668_vm1, %v2667_v2 }
 0x26d   :  { %v1185_v0 = vmax.f32 %v1060_v63, 0.0 }
 0x26e   :  { %v1064_v10 = vpop.f32.mrb[158].mxu1 }
 0x26f   :  { %v1065_v6 = vadd.f32 %v3442_v5, %v1064_v10  ;;  %v2323_v56 = vpop.f32.mrb[159].mxu1  ;;  %2540 = vmatmul.mubr.f32.gmra.mrb[158].mxu0 %v1185_v0 }
 0x270   :  { %2542 = vmatprep.mubr.msk.f32.mxu0 %vm2668_vm1, %v2667_v2 }
 0x271   :  { %v1186_v16 = vmax.f32 %v1065_v6, 0.0 }
 0x272   :  { %v1069_v8 = vpop.f32.mrb[160].mxu1 }
 0x273   :  { %v1070_v24 = vadd.f32 %v3442_v5, %v1069_v8  ;;  %v2326_v9 = vpop.f32.mrb[161].mxu1  ;;  %2543 = vmatmul.mubr.f32.gmra.mrb[160].mxu0 %v1186_v16 }
 0x274   :  { %2545 = vmatprep.mubr.msk.f32.mxu0 %vm2668_vm1, %v2667_v2 }
 0x275   :  { %v1187_v31 = vmax.f32 %v1070_v24, 0.0 }
 0x276   :  { %v1074_v1 = vpop.f32.mrb[162].mxu1 }
 0x277   :  { %v1075_v11 = vadd.f32 %v3442_v5, %v1074_v1  ;;  %v2329_v38 = vpop.f32.mrb[163].mxu1  ;;  %2546 = vmatmul.mubr.f32.gmra.mrb[162].mxu0 %v1187_v31 }
 0x278   :  { %2548 = vmatprep.mubr.msk.f32.mxu0 %vm2668_vm1, %v2667_v2 }
 0x279   :  { %v1188_v12 = vmax.f32 %v1075_v11, 0.0 }
 0x27a   :  { %v1079_v44 = vpop.f32.mrb[164].mxu1 }
 0x27b   :  { %v1080_v17 = vadd.f32 %v3442_v5, %v1079_v44  ;;  %v2332_v15 = vpop.f32.mrb[165].mxu1  ;;  %2549 = vmatmul.mubr.f32.gmra.mrb[164].mxu0 %v1188_v12 }
 0x27c   :  { %2551 = vmatprep.mubr.msk.f32.mxu0 %vm2668_vm1, %v2667_v2 }
 0x27d   :  { %v1189_v54 = vmax.f32 %v1080_v17, 0.0 }
 0x27e   :  { %v1084_v18 = vpop.f32.mrb[166].mxu1 }
 0x27f   :  { %v1085_v62 = vadd.f32 %v3442_v5, %v1084_v18  ;;  %v2335_v19 = vpop.f32.mrb[167].mxu1  ;;  %2552 = vmatmul.mubr.f32.gmra.mrb[166].mxu0 %v1189_v54 }
 0x280   :  { %2554 = vmatprep.mubr.msk.f32.mxu0 %vm2668_vm1, %v2667_v2 }
 0x281   :  { %v1190_v7 = vmax.f32 %v1085_v62, 0.0 }
 0x282   :  { %v1089_v25 = vpop.f32.mrb[168].mxu1 }
 0x283   :  { %v1090_v20 = vadd.f32 %v3442_v5, %v1089_v25  ;;  %v2338_v14 = vpop.f32.mrb[169].mxu1  ;;  %2555 = vmatmul.mubr.f32.gmra.mrb[168].mxu0 %v1190_v7 }
 0x284   :  { %2557 = vmatprep.mubr.msk.f32.mxu0 %vm2668_vm1, %v2667_v2 }
 0x285   :  { %v1191_v23 = vmax.f32 %v1090_v20, 0.0 }
 0x286   :  { %v1094_v26 = vpop.f32.mrb[170].mxu1  ;;  %v1272_v35 = vpop.f32.mrb[64].mxu0 }
 0x287   :  { %v1095_v32 = vadd.f32 %v3442_v5, %v1094_v26  ;;  %v1273_v27 = vadd.f32 %v3643_v22, %v1272_v35  ;;  %v2341_v40 = vpop.f32.mrb[171].mxu1  ;;  %v2400_v28 = vpop.f32.mrb[65].mxu0  ;;  %2558 = vmatmul.mubr.f32.gmra.mrb[170].mxu0 %v1191_v23 }
 0x288   :  { %2560 = vmatprep.mubr.msk.f32.mxu0 %vm2668_vm1, %v2667_v2 }
 0x289   :  { %v1192_v47 = vmax.f32 %v1095_v32, 0.0  ;;  %1586 = vst [vmem:[#allocation2] sm:$0xff] %v1273_v27 }
 0x28a   :  { %v1099_v30 = vpop.f32.mrb[172].mxu1  ;;  %v1277_v34 = vpop.f32.mrb[66].mxu0 }
 0x28b   :  { %v1100_v43 = vadd.f32 %v3442_v5, %v1099_v30  ;;  %v1278_v57 = vadd.f32 %v3643_v22, %v1277_v34  ;;  %v2344_v33 = vpop.f32.mrb[173].mxu1  ;;  %v2403_v36 = vpop.f32.mrb[67].mxu0  ;;  %2561 = vmatmul.mubr.f32.gmra.mrb[172].mxu0 %v1192_v47 }
 0x28c   :  { %2563 = vmatprep.mubr.msk.f32.mxu0 %vm2668_vm1, %v2667_v2 }
 0x28d   :  { %v1193_v13 = vmax.f32 %v1100_v43, 0.0  ;;  %1587 = vst [vmem:[#allocation2 + $0x8] sm:$0xff] %v1278_v57 }
 0x28e   :  { %v1104_v37 = vpop.f32.mrb[174].mxu1  ;;  %v1282_v41 = vpop.f32.mrb[68].mxu0 }
 0x28f   :  { %v1105_v42 = vadd.f32 %v3442_v5, %v1104_v37  ;;  %v1283_v21 = vadd.f32 %v3643_v22, %v1282_v41  ;;  %v2347_v4 = vpop.f32.mrb[175].mxu1  ;;  %v2406_v46 = vpop.f32.mrb[69].mxu0  ;;  %2564 = vmatmul.mubr.f32.gmra.mrb[174].mxu0 %v1193_v13 }
 0x290   :  { %2566 = vmatprep.mubr.msk.f32.mxu0 %vm2668_vm1, %v2667_v2 }
 0x291   :  { %v1194_v49 = vmax.f32 %v1105_v42, 0.0  ;;  %1588 = vst [vmem:[#allocation2 + $0x10] sm:$0xff] %v1283_v21 }
 0x292   :  { %v1109_v50 = vpop.f32.mrb[176].mxu1  ;;  %v1287_v52 = vpop.f32.mrb[70].mxu0 }
 0x293   :  { %v1110_v29 = vadd.f32 %v3442_v5, %v1109_v50  ;;  %v1288_v53 = vadd.f32 %v3643_v22, %v1287_v52  ;;  %v2350_v55 = vpop.f32.mrb[177].mxu1  ;;  %v2409_v58 = vpop.f32.mrb[71].mxu0  ;;  %2567 = vmatmul.mubr.f32.gmra.mrb[176].mxu0 %v1194_v49 }
 0x294   :  { %2569 = vmatprep.mubr.msk.f32.mxu0 %vm2668_vm1, %v2667_v2 }
 0x295   :  { %v1195_v39 = vmax.f32 %v1110_v29, 0.0  ;;  %1589 = vst [vmem:[#allocation2 + $0x18] sm:$0xff] %v1288_v53 }
 0x296   :  { %v1114_v45 = vpop.f32.mrb[178].mxu1  ;;  %v1292_v60 = vpop.f32.mrb[72].mxu0 }
 0x297   :  { %v1115_v51 = vadd.f32 %v3442_v5, %v1114_v45  ;;  %v1293_v61 = vadd.f32 %v3643_v22, %v1292_v60  ;;  %v2353_v59 = vpop.f32.mrb[179].mxu1  ;;  %v2412_v48 = vpop.f32.mrb[73].mxu0  ;;  %2570 = vmatmul.mubr.f32.gmra.mrb[178].mxu0 %v1195_v39 }
 0x298   :  { %2572 = vmatprep.mubr.msk.f32.mxu0 %vm2668_vm1, %v2667_v2 }
 0x299   :  { %v1196_v63 = vmax.f32 %v1115_v51, 0.0  ;;  %1590 = vst [vmem:[#allocation2 + $0x20] sm:$0xff] %v1293_v61 }
 0x29a   :  { %v1119_v3 = vpop.f32.mrb[180].mxu1  ;;  %v1297_v0 = vpop.f32.mrb[74].mxu0 }
 0x29b   :  { %v1120_v10 = vadd.f32 %v3442_v5, %v1119_v3  ;;  %v1298_v6 = vadd.f32 %v3643_v22, %v1297_v0  ;;  %v2356_v56 = vpop.f32.mrb[181].mxu1  ;;  %v2415_v16 = vpop.f32.mrb[75].mxu0  ;;  %2573 = vmatmul.mubr.f32.gmra.mrb[180].mxu0 %v1196_v63 }
 0x29c   :  { %2575 = vmatprep.mubr.msk.f32.mxu0 %vm2668_vm1, %v2667_v2 }
 0x29d   :  { %v1197_v8 = vmax.f32 %v1120_v10, 0.0  ;;  %1591 = vst [vmem:[#allocation2 + $0x28] sm:$0xff] %v1298_v6 }
 0x29e   :  { %v1124_v24 = vpop.f32.mrb[182].mxu1  ;;  %v1302_v9 = vpop.f32.mrb[76].mxu0 }
 0x29f   :  { %v1125_v31 = vadd.f32 %v3442_v5, %v1124_v24  ;;  %v1303_v1 = vadd.f32 %v3643_v22, %v1302_v9  ;;  %v2359_v11 = vpop.f32.mrb[183].mxu1  ;;  %v2418_v38 = vpop.f32.mrb[77].mxu0  ;;  %2576 = vmatmul.mubr.f32.gmra.mrb[182].mxu0 %v1197_v8 }
 0x2a0   :  { %2578 = vmatprep.mubr.msk.f32.mxu0 %vm2668_vm1, %v2667_v2 }
 0x2a1   :  { %v1198_v12 = vmax.f32 %v1125_v31, 0.0  ;;  %1592 = vst [vmem:[#allocation2 + $0x30] sm:$0xff] %v1303_v1 }
 0x2a2   :  { %v1129_v44 = vpop.f32.mrb[184].mxu1  ;;  %v1307_v17 = vpop.f32.mrb[78].mxu0 }
 0x2a3   :  { %v1130_v15 = vadd.f32 %v3442_v5, %v1129_v44  ;;  %v1308_v54 = vadd.f32 %v3643_v22, %v1307_v17  ;;  %v2362_v18 = vpop.f32.mrb[185].mxu1  ;;  %v2421_v62 = vpop.f32.mrb[79].mxu0  ;;  %2579 = vmatmul.mubr.f32.gmra.mrb[184].mxu0 %v1198_v12 }
 0x2a4   :  { %2581 = vmatprep.mubr.msk.f32.mxu0 %vm2668_vm1, %v2667_v2 }
 0x2a5   :  { %v1199_v19 = vmax.f32 %v1130_v15, 0.0  ;;  %1593 = vst [vmem:[#allocation2 + $0x38] sm:$0xff] %v1308_v54 }
 0x2a6   :  { %v1134_v7 = vpop.f32.mrb[186].mxu1  ;;  %v1312_v25 = vpop.f32.mrb[80].mxu0 }
 0x2a7   :  { %v1135_v20 = vadd.f32 %v3442_v5, %v1134_v7  ;;  %v1313_v14 = vadd.f32 %v3643_v22, %v1312_v25  ;;  %v2365_v23 = vpop.f32.mrb[187].mxu1  ;;  %v2424_v26 = vpop.f32.mrb[81].mxu0  ;;  %2582 = vmatmul.mubr.f32.gmra.mrb[186].mxu0 %v1199_v19 }
 0x2a8   :  { %2584 = vmatprep.mubr.msk.f32.mxu0 %vm2668_vm1, %v2667_v2 }
 0x2a9   :  { %v1200_v35 = vmax.f32 %v1135_v20, 0.0  ;;  %1594 = vst [vmem:[#allocation2 + $0x40] sm:$0xff] %v1313_v14 }
 0x2aa   :  { %v1317_v32 = vpop.f32.mrb[82].mxu0 }
 0x2ab   :  { %v1318_v27 = vadd.f32 %v3643_v22, %v1317_v32  ;;  %v2427_v40 = vpop.f32.mrb[83].mxu0  ;;  %2585 = vmatmul.mubr.f32.gmra.mrb[188].mxu0 %v1200_v35 }
 0x2ad   :  { %1595 = vst [vmem:[#allocation2 + $0x48] sm:$0xff] %v1318_v27 }
 0x2ae   :  { %v1322_v28 = vpop.f32.mrb[84].mxu0 }
 0x2af   :  { %v1323_v47 = vadd.f32 %v3643_v22, %v1322_v28  ;;  %v2430_v5 = vpop.f32.mrb[85].mxu0 }
 0x2b1   :  { %1596 = vst [vmem:[#allocation2 + $0x50] sm:$0xff] %v1323_v47 }
 0x2b2   :  { %v1327_v30 = vpop.f32.mrb[86].mxu0 }
 0x2b3   :  { %v1328_v34 = vadd.f32 %v3643_v22, %v1327_v30  ;;  %v2433_v43 = vpop.f32.mrb[87].mxu0 }
 0x2b5   :  { %1597 = vst [vmem:[#allocation2 + $0x58] sm:$0xff] %v1328_v34 }
 0x2b6   :  { %v1332_v57 = vpop.f32.mrb[88].mxu0 }
 0x2b7   :  { %v1333_v2 = vadd.f32 %v3643_v22, %v1332_v57  ;;  %v2436_v33 = vpop.f32.mrb[89].mxu0 }
 0x2b9   :  { %1598 = vst [vmem:[#allocation2 + $0x60] sm:$0xff] %v1333_v2 }
 0x2ba   :  { %v1337_v36 = vpop.f32.mrb[90].mxu0 }
 0x2bb   :  { %v1338_v13 = vadd.f32 %v3643_v22, %v1337_v36  ;;  %v2439_v37 = vpop.f32.mrb[91].mxu0 }
 0x2bd   :  { %1599 = vst [vmem:[#allocation2 + $0x68] sm:$0xff] %v1338_v13 }
 0x2be   :  { %v1342_v41 = vpop.f32.mrb[92].mxu0 }
 0x2bf   :  { %v1343_v42 = vadd.f32 %v3643_v22, %v1342_v41  ;;  %v2442_v21 = vpop.f32.mrb[93].mxu0 }
 0x2c1   :  { %1600 = vst [vmem:[#allocation2 + $0x70] sm:$0xff] %v1343_v42 }
 0x2c2   :  { %v1347_v4 = vpop.f32.mrb[94].mxu0 }
 0x2c3   :  { %v1348_v46 = vadd.f32 %v3643_v22, %v1347_v4  ;;  %v2445_v49 = vpop.f32.mrb[95].mxu0 }
 0x2c5   :  { %1601 = vst [vmem:[#allocation2 + $0x78] sm:$0xff] %v1348_v46 }
 0x2c6   :  { %v1352_v50 = vpop.f32.mrb[96].mxu0 }
 0x2c7   :  { %v1353_v52 = vadd.f32 %v3643_v22, %v1352_v50  ;;  %v2448_v29 = vpop.f32.mrb[97].mxu0 }
 0x2c9   :  { %1602 = vst [vmem:[#allocation2 + $0x80] sm:$0xff] %v1353_v52 }
 0x2ca   :  { %v1357_v53 = vpop.f32.mrb[98].mxu0 }
 0x2cb   :  { %v1358_v55 = vadd.f32 %v3643_v22, %v1357_v53  ;;  %v2451_v58 = vpop.f32.mrb[99].mxu0 }
 0x2cd   :  { %1603 = vst [vmem:[#allocation2 + $0x88] sm:$0xff] %v1358_v55 }
 0x2ce   :  { %v1362_v39 = vpop.f32.mrb[100].mxu0 }
 0x2cf   :  { %v1363_v45 = vadd.f32 %v3643_v22, %v1362_v39  ;;  %v2454_v60 = vpop.f32.mrb[101].mxu0 }
 0x2d1   :  { %1604 = vst [vmem:[#allocation2 + $0x90] sm:$0xff] %v1363_v45 }
 0x2d2   :  { %v1367_v51 = vpop.f32.mrb[102].mxu0 }
 0x2d3   :  { %v1368_v61 = vadd.f32 %v3643_v22, %v1367_v51  ;;  %v2457_v59 = vpop.f32.mrb[103].mxu0 }
 0x2d5   :  { %1605 = vst [vmem:[#allocation2 + $0x98] sm:$0xff] %v1368_v61 }
 0x2d6   :  { %v1372_v48 = vpop.f32.mrb[104].mxu0 }
 0x2d7   :  { %v1373_v63 = vadd.f32 %v3643_v22, %v1372_v48  ;;  %v2460_v3 = vpop.f32.mrb[105].mxu0 }
 0x2d9   :  { %1606 = vst [vmem:[#allocation2 + $0xa0] sm:$0xff] %v1373_v63 }
 0x2da   :  { %v1377_v0 = vpop.f32.mrb[106].mxu0 }
 0x2db   :  { %v1378_v10 = vadd.f32 %v3643_v22, %v1377_v0  ;;  %v2463_v6 = vpop.f32.mrb[107].mxu0 }
 0x2dd   :  { %1607 = vst [vmem:[#allocation2 + $0xa8] sm:$0xff] %v1378_v10 }
 0x2de   :  { %v1382_v56 = vpop.f32.mrb[108].mxu0 }
 0x2df   :  { %v1383_v16 = vadd.f32 %v3643_v22, %v1382_v56  ;;  %v2466_v8 = vpop.f32.mrb[109].mxu0 }
 0x2e1   :  { %1608 = vst [vmem:[#allocation2 + $0xb0] sm:$0xff] %v1383_v16 }
 0x2e2   :  { %v1387_v24 = vpop.f32.mrb[110].mxu0 }
 0x2e3   :  { %v1388_v9 = vadd.f32 %v3643_v22, %v1387_v24  ;;  %v2469_v31 = vpop.f32.mrb[111].mxu0 }
 0x2e5   :  { %1609 = vst [vmem:[#allocation2 + $0xb8] sm:$0xff] %v1388_v9 }
 0x2e6   :  { %v1392_v1 = vpop.f32.mrb[112].mxu0 }
 0x2e7   :  { %v1393_v11 = vadd.f32 %v3643_v22, %v1392_v1  ;;  %v2472_v38 = vpop.f32.mrb[113].mxu0 }
 0x2e9   :  { %1610 = vst [vmem:[#allocation2 + $0xc0] sm:$0xff] %v1393_v11 }
 0x2ea   :  { %v1397_v12 = vpop.f32.mrb[114].mxu0 }
 0x2eb   :  { %v1398_v44 = vadd.f32 %v3643_v22, %v1397_v12  ;;  %v2475_v17 = vpop.f32.mrb[115].mxu0 }
 0x2ed   :  { %1611 = vst [vmem:[#allocation2 + $0xc8] sm:$0xff] %v1398_v44 }
 0x2ee   :  { %v1402_v15 = vpop.f32.mrb[116].mxu0 }
 0x2ef   :  { %v1403_v54 = vadd.f32 %v3643_v22, %v1402_v15  ;;  %v2478_v18 = vpop.f32.mrb[117].mxu0 }
 0x2f1   :  { %1612 = vst [vmem:[#allocation2 + $0xd0] sm:$0xff] %v1403_v54 }
 0x2f2   :  { %v1407_v62 = vpop.f32.mrb[118].mxu0 }
 0x2f3   :  { %v1408_v19 = vadd.f32 %v3643_v22, %v1407_v62  ;;  %v2481_v7 = vpop.f32.mrb[119].mxu0 }
 0x2f5   :  { %1613 = vst [vmem:[#allocation2 + $0xd8] sm:$0xff] %v1408_v19 }
 0x2f6   :  { %v1412_v25 = vpop.f32.mrb[120].mxu0 }
 0x2f7   :  { %v1413_v20 = vadd.f32 %v3643_v22, %v1412_v25  ;;  %v2484_v14 = vpop.f32.mrb[121].mxu0 }
 0x2f9   :  { %1614 = vst [vmem:[#allocation2 + $0xe0] sm:$0xff] %v1413_v20 }
 0x2fa   :  { %v1417_v23 = vpop.f32.mrb[122].mxu0 }
 0x2fb   :  { %v1418_v26 = vadd.f32 %v3643_v22, %v1417_v23  ;;  %v2487_v35 = vpop.f32.mrb[123].mxu0 }
 0x2fd   :  { %1615 = vst [vmem:[#allocation2 + $0xe8] sm:$0xff] %v1418_v26 }
 0x2fe   :  { %v1422_v32 = vpop.f32.mrb[124].mxu0 }
 0x2ff   :  { %v1423_v27 = vadd.f32 %v3643_v22, %v1422_v32  ;;  %v2490_v40 = vpop.f32.mrb[125].mxu0 }
 0x301   :  { %1616 = vst [vmem:[#allocation2 + $0xf0] sm:$0xff] %v1423_v27 }
 0x302   :  { %v1427_v28 = vpop.f32.mrb[126].mxu0 }
 0x303   :  { %v1428_v47 = vadd.f32 %v3643_v22, %v1427_v28  ;;  %v2493_v5 = vpop.f32.mrb[127].mxu0 }
 0x305   :  { %1617 = vst [vmem:[#allocation2 + $0xf8] sm:$0xff] %v1428_v47 }
 0x306   :  { %v1432_v30 = vpop.f32.mrb[128].mxu0 }
 0x307   :  { %v1433_v34 = vadd.f32 %v3643_v22, %v1432_v30  ;;  %v2496_v43 = vpop.f32.mrb[129].mxu0 }
 0x309   :  { %1618 = vst [vmem:[#allocation2 + $0x100] sm:$0xff] %v1433_v34 }
 0x30a   :  { %v1437_v57 = vpop.f32.mrb[130].mxu0 }
 0x30b   :  { %v1438_v2 = vadd.f32 %v3643_v22, %v1437_v57  ;;  %v2499_v33 = vpop.f32.mrb[131].mxu0 }
 0x30d   :  { %1619 = vst [vmem:[#allocation2 + $0x108] sm:$0xff] %v1438_v2 }
 0x30e   :  { %v1442_v36 = vpop.f32.mrb[132].mxu0 }
 0x30f   :  { %v1443_v13 = vadd.f32 %v3643_v22, %v1442_v36  ;;  %v2502_v37 = vpop.f32.mrb[133].mxu0 }
 0x311   :  { %1620 = vst [vmem:[#allocation2 + $0x110] sm:$0xff] %v1443_v13 }
 0x312   :  { %v1447_v41 = vpop.f32.mrb[134].mxu0 }
 0x313   :  { %v1448_v42 = vadd.f32 %v3643_v22, %v1447_v41  ;;  %v2505_v21 = vpop.f32.mrb[135].mxu0 }
 0x315   :  { %1621 = vst [vmem:[#allocation2 + $0x118] sm:$0xff] %v1448_v42 }
 0x316   :  { %v1452_v4 = vpop.f32.mrb[136].mxu0 }
 0x317   :  { %v1453_v46 = vadd.f32 %v3643_v22, %v1452_v4  ;;  %v2508_v49 = vpop.f32.mrb[137].mxu0 }
 0x319   :  { %1622 = vst [vmem:[#allocation2 + $0x120] sm:$0xff] %v1453_v46 }
 0x31a   :  { %v1457_v50 = vpop.f32.mrb[138].mxu0 }
 0x31b   :  { %v1458_v52 = vadd.f32 %v3643_v22, %v1457_v50  ;;  %v2511_v29 = vpop.f32.mrb[139].mxu0 }
 0x31d   :  { %1623 = vst [vmem:[#allocation2 + $0x128] sm:$0xff] %v1458_v52 }
 0x31e   :  { %v1462_v53 = vpop.f32.mrb[140].mxu0 }
 0x31f   :  { %v1463_v55 = vadd.f32 %v3643_v22, %v1462_v53  ;;  %v2514_v58 = vpop.f32.mrb[141].mxu0 }
 0x321   :  { %1624 = vst [vmem:[#allocation2 + $0x130] sm:$0xff] %v1463_v55 }
 0x322   :  { %v1467_v39 = vpop.f32.mrb[142].mxu0 }
 0x323   :  { %v1468_v45 = vadd.f32 %v3643_v22, %v1467_v39  ;;  %v2517_v60 = vpop.f32.mrb[143].mxu0 }
 0x325   :  { %1625 = vst [vmem:[#allocation2 + $0x138] sm:$0xff] %v1468_v45 }
 0x326   :  { %v1472_v51 = vpop.f32.mrb[144].mxu0 }
 0x327   :  { %v1473_v61 = vadd.f32 %v3643_v22, %v1472_v51  ;;  %v2520_v59 = vpop.f32.mrb[145].mxu0 }
 0x329   :  { %1626 = vst [vmem:[#allocation2 + $0x140] sm:$0xff] %v1473_v61 }
 0x32a   :  { %v1477_v48 = vpop.f32.mrb[146].mxu0 }
 0x32b   :  { %v1478_v63 = vadd.f32 %v3643_v22, %v1477_v48  ;;  %v2523_v3 = vpop.f32.mrb[147].mxu0 }
 0x32d   :  { %1627 = vst [vmem:[#allocation2 + $0x148] sm:$0xff] %v1478_v63 }
 0x32e   :  { %v1482_v0 = vpop.f32.mrb[148].mxu0 }
 0x32f   :  { %v1483_v10 = vadd.f32 %v3643_v22, %v1482_v0  ;;  %v2526_v6 = vpop.f32.mrb[149].mxu0 }
 0x331   :  { %1628 = vst [vmem:[#allocation2 + $0x150] sm:$0xff] %v1483_v10 }
 0x332   :  { %v1487_v56 = vpop.f32.mrb[150].mxu0 }
 0x333   :  { %v1488_v16 = vadd.f32 %v3643_v22, %v1487_v56  ;;  %v2529_v8 = vpop.f32.mrb[151].mxu0 }
 0x335   :  { %1629 = vst [vmem:[#allocation2 + $0x158] sm:$0xff] %v1488_v16 }
 0x336   :  { %v1492_v24 = vpop.f32.mrb[152].mxu0 }
 0x337   :  { %v1493_v9 = vadd.f32 %v3643_v22, %v1492_v24  ;;  %v2532_v31 = vpop.f32.mrb[153].mxu0 }
 0x339   :  { %1630 = vst [vmem:[#allocation2 + $0x160] sm:$0xff] %v1493_v9 }
 0x33a   :  { %v1497_v1 = vpop.f32.mrb[154].mxu0 }
 0x33b   :  { %v1498_v11 = vadd.f32 %v3643_v22, %v1497_v1  ;;  %v2535_v38 = vpop.f32.mrb[155].mxu0 }
 0x33d   :  { %1631 = vst [vmem:[#allocation2 + $0x168] sm:$0xff] %v1498_v11 }
 0x33e   :  { %v1502_v12 = vpop.f32.mrb[156].mxu0 }
 0x33f   :  { %v1503_v44 = vadd.f32 %v3643_v22, %v1502_v12  ;;  %v2538_v17 = vpop.f32.mrb[157].mxu0 }
 0x341   :  { %1632 = vst [vmem:[#allocation2 + $0x170] sm:$0xff] %v1503_v44 }
 0x342   :  { %v1507_v15 = vpop.f32.mrb[158].mxu0 }
 0x343   :  { %v1508_v54 = vadd.f32 %v3643_v22, %v1507_v15  ;;  %v2541_v18 = vpop.f32.mrb[159].mxu0 }
 0x345   :  { %1633 = vst [vmem:[#allocation2 + $0x178] sm:$0xff] %v1508_v54 }
 0x346   :  { %v1512_v62 = vpop.f32.mrb[160].mxu0 }
 0x347   :  { %v1513_v19 = vadd.f32 %v3643_v22, %v1512_v62  ;;  %v2544_v7 = vpop.f32.mrb[161].mxu0 }
 0x349   :  { %1634 = vst [vmem:[#allocation2 + $0x180] sm:$0xff] %v1513_v19 }
 0x34a   :  { %v1517_v25 = vpop.f32.mrb[162].mxu0 }
 0x34b   :  { %v1518_v20 = vadd.f32 %v3643_v22, %v1517_v25  ;;  %v2547_v14 = vpop.f32.mrb[163].mxu0 }
 0x34d   :  { %1635 = vst [vmem:[#allocation2 + $0x188] sm:$0xff] %v1518_v20 }
 0x34e   :  { %v1522_v23 = vpop.f32.mrb[164].mxu0 }
 0x34f   :  { %v1523_v26 = vadd.f32 %v3643_v22, %v1522_v23  ;;  %v2550_v35 = vpop.f32.mrb[165].mxu0 }
 0x351   :  { %1636 = vst [vmem:[#allocation2 + $0x190] sm:$0xff] %v1523_v26 }
 0x352   :  { %v1527_v32 = vpop.f32.mrb[166].mxu0 }
 0x353   :  { %v1528_v27 = vadd.f32 %v3643_v22, %v1527_v32  ;;  %v2553_v40 = vpop.f32.mrb[167].mxu0 }
 0x355   :  { %1637 = vst [vmem:[#allocation2 + $0x198] sm:$0xff] %v1528_v27 }
 0x356   :  { %v1532_v28 = vpop.f32.mrb[168].mxu0 }
 0x357   :  { %v1533_v47 = vadd.f32 %v3643_v22, %v1532_v28  ;;  %v2556_v5 = vpop.f32.mrb[169].mxu0 }
 0x359   :  { %1638 = vst [vmem:[#allocation2 + $0x1a0] sm:$0xff] %v1533_v47 }
 0x35a   :  { %v1537_v30 = vpop.f32.mrb[170].mxu0 }
 0x35b   :  { %v1538_v34 = vadd.f32 %v3643_v22, %v1537_v30  ;;  %v2559_v43 = vpop.f32.mrb[171].mxu0 }
 0x35d   :  { %1639 = vst [vmem:[#allocation2 + $0x1a8] sm:$0xff] %v1538_v34 }
 0x35e   :  { %v1542_v57 = vpop.f32.mrb[172].mxu0 }
 0x35f   :  { %v1543_v2 = vadd.f32 %v3643_v22, %v1542_v57  ;;  %v2562_v33 = vpop.f32.mrb[173].mxu0 }
 0x361   :  { %1640 = vst [vmem:[#allocation2 + $0x1b0] sm:$0xff] %v1543_v2 }
 0x362   :  { %v1547_v36 = vpop.f32.mrb[174].mxu0 }
 0x363   :  { %v1548_v13 = vadd.f32 %v3643_v22, %v1547_v36  ;;  %v2565_v37 = vpop.f32.mrb[175].mxu0 }
 0x365   :  { %1641 = vst [vmem:[#allocation2 + $0x1b8] sm:$0xff] %v1548_v13 }
 0x366   :  { %v1552_v41 = vpop.f32.mrb[176].mxu0 }
 0x367   :  { %v1553_v42 = vadd.f32 %v3643_v22, %v1552_v41  ;;  %v2568_v21 = vpop.f32.mrb[177].mxu0 }
 0x369   :  { %1642 = vst [vmem:[#allocation2 + $0x1c0] sm:$0xff] %v1553_v42 }
 0x36a   :  { %v1557_v4 = vpop.f32.mrb[178].mxu0 }
 0x36b   :  { %v1558_v46 = vadd.f32 %v3643_v22, %v1557_v4  ;;  %v2571_v49 = vpop.f32.mrb[179].mxu0 }
 0x36d   :  { %1643 = vst [vmem:[#allocation2 + $0x1c8] sm:$0xff] %v1558_v46 }
 0x36e   :  { %v1562_v50 = vpop.f32.mrb[180].mxu0 }
 0x36f   :  { %v1563_v52 = vadd.f32 %v3643_v22, %v1562_v50  ;;  %v2574_v29 = vpop.f32.mrb[181].mxu0 }
 0x371   :  { %1644 = vst [vmem:[#allocation2 + $0x1d0] sm:$0xff] %v1563_v52 }
 0x372   :  { %v1567_v53 = vpop.f32.mrb[182].mxu0 }
 0x373   :  { %v1568_v55 = vadd.f32 %v3643_v22, %v1567_v53  ;;  %v2577_v58 = vpop.f32.mrb[183].mxu0 }
 0x375   :  { %1645 = vst [vmem:[#allocation2 + $0x1d8] sm:$0xff] %v1568_v55 }
 0x376   :  { %v1572_v39 = vpop.f32.mrb[184].mxu0 }
 0x377   :  { %v1573_v45 = vadd.f32 %v3643_v22, %v1572_v39  ;;  %v2580_v60 = vpop.f32.mrb[185].mxu0 }
 0x379   :  { %1646 = vst [vmem:[#allocation2 + $0x1e0] sm:$0xff] %v1573_v45 }
 0x37a   :  { %v1577_v51 = vpop.f32.mrb[186].mxu0 }
 0x37b   :  { %v1578_v61 = vadd.f32 %v3643_v22, %v1577_v51  ;;  %v2583_v59 = vpop.f32.mrb[187].mxu0 }
 0x37d   :  { %1647 = vst [vmem:[#allocation2 + $0x1e8] sm:$0xff] %v1578_v61 }
 0x37e   :  { %v1582_v48 = vpop.f32.mrb[188].mxu0 }
 0x37f   :  { %v1583_v63 = vadd.f32 %v3643_v22, %v1582_v48  ;;  %v2586_v3 = vpop.f32.mrb[189].mxu0 }
 0x381   :  { %1648 = vst [vmem:[#allocation2 + $0x1f0] sm:$0xff] %v1583_v63 }
 0x382   :  { %2654 = shalt.err (!%p2651_p4)
}
 0x383   :  { %s2655_s22 = scalar_lea.hbm %s3752_s3, 8064 }
 0x384   :  { %p2656_p5 = scmp.ne.s32.totalorder %s3752_s3, %s2655_s22  ;;  %p2659_p6 = scmp.lt.u32.totalorder %s2655_s22, %s3752_s3 }
 0x386   :  { %p2661_p7 = pnand %p2659_p6, %p2656_p5 }
 0x388   :  { %2664 = shalt.err (!%p2661_p7)
}
 0x389   :  { %s2671_s27 = smov 128   ;;  %s2672_s28 = smov 8  }
 0x38a   :  { %1660 = dma.vmem_to_hbm [thread:$0]  %s1655_s18, 8064, %s3752_s3, [#allocation3], %s2671_s27, %s2671_s27, %s2672_s28  }
 0x38b   :  { %2665 = dma.done.wait [#allocation3], 8064  }
 0x38c   :  { %2666 = vsyncadd [#allocation3], 4294959232 }
 0x38d   :  { %1664 = vsyncpa [#allocation3], 1 }

</bundles_post_ra>
